<compile_context>
chip_gen: v7x
topology: tpu7x:2x2x1
jax: 0.10.0
libtpu: 0.0.40
codegen_flags: <defaults>
</compile_context>

<pallas_src>
import functools

import jax
import jax.numpy as jnp
from jax.experimental import pallas as pl
from jax.experimental.pallas import tpu as pltpu


def _round_up(n, m):
    return ((n + m - 1) // m) * m


def _char_decoder_kernel(gx_ref, h0_ref, c0_ref, whh_ref, wproj_ref, bproj_ref,
                         scores_ref, hT_ref, cT_ref,
                         h_scr, c_scr, hs_scr, cs_scr,
                         *, t_chunk, b_pad, h_pad, last_valid_row, mxu_dtype, unroll):
    ci = pl.program_id(0)

    @pl.when(ci == 0)
    def _():
        h_scr[...] = h0_ref[...]
        c_scr[...] = c0_ref[...]

    H = h_pad  # multiple of 128 -> gate slices are lane-aligned

    # ---- serial LSTM recurrence over this chunk (unrolled, no per-step masking) ----
    # gx_ref already contains x@W_ih + b (folded into the embedding table wrapper-side),
    # so only the tiny (8, H) @ (H, 4H) recurrent matmul sits on the serial chain.
    def step(t, carry):
        h, c = carry
        gates = gx_ref[t] + jnp.dot(h.astype(mxu_dtype), whh_ref[...],
                                    preferred_element_type=jnp.float32)
        i_g = jax.nn.sigmoid(gates[:, 0 * H:1 * H])
        f_g = jax.nn.sigmoid(gates[:, 1 * H:2 * H])
        g_g = jnp.tanh(gates[:, 2 * H:3 * H])
        o_g = jax.nn.sigmoid(gates[:, 3 * H:4 * H])
        c_new = f_g * c + i_g * g_g
        h_new = o_g * jnp.tanh(c_new)
        hs_scr[t] = h_new          # off-chain stores (feed the batched vocab projection
        cs_scr[t] = c_new          # and the last-chunk final-state extraction)
        return h_new, c_new

    h_fin, c_fin = jax.lax.fori_loop(0, t_chunk, step,
                                     (h_scr[...], c_scr[...]), unroll=unroll)
    # Carry across chunks.  In the (only possibly ragged) last chunk this includes padded tail
    # steps, but there is no next chunk so it is never consumed.
    h_scr[...] = h_fin
    c_scr[...] = c_fin

    # Final-state outputs: written only in the last chunk, taken at the last *real* time step.
    @pl.when(ci == pl.num_programs(0) - 1)
    def _():
        hT_ref[...] = hs_scr[last_valid_row].astype(hT_ref.dtype)
        cT_ref[...] = cs_scr[last_valid_row].astype(cT_ref.dtype)

    # ---- batched vocab projection for the whole chunk (lane-dense store, V padded to 128) ----
    hs = hs_scr[...].reshape(t_chunk * b_pad, h_pad).astype(mxu_dtype)
    scores = (jnp.dot(hs, wproj_ref[...], preferred_element_type=jnp.float32)
              + bproj_ref[...])
    scores_ref[...] = scores.reshape(t_chunk, b_pad, -1).astype(scores_ref.dtype)


def _pad_gate_cols(w, H, H_pad):
    """Re-lay-out gate-stacked columns (..., 4H) -> (..., 4*H_pad), each gate at g*H_pad."""
    parts = [jnp.pad(w[:, g * H:(g + 1) * H], ((0, 0), (0, H_pad - H)))
             for g in range(4)]
    return jnp.concatenate(parts, axis=1)


def char_decoder_forward(input_ids, params, dec_hidden=None,
                         t_chunk_max=256, use_bf16_weights=True):
    """Equivalent of CharDecoder.forward.

    input_ids : (L, B) int32
    returns   : scores (L, B, V), (h_n, c_n) each (1, B, H)
    """
    emb = params["emb"]            # (V, E)
    w_ih = params["w_ih"]          # (E, 4H)
    w_hh = params["w_hh"]          # (H, 4H)
    b = params["b"]                # (1, 4H)  (= b_ih + b_hh)
    w_proj = params["w_proj"]      # (H, V)
    b_proj = params["b_proj"]      # (1, V)

    L, B = input_ids.shape
    V, E = emb.shape
    H = w_hh.shape[0]

    # ---- padding to vreg/MXU friendly sizes (wrapper-side, zero padded) ----
    B_pad = _round_up(B, 8)        # f32 sublane
    H_pad = _round_up(H, 128)      # lane-aligned gate slices & recurrent matmul
    V_pad = _round_up(V, 128)      # lane-dense score stores

    t_chunk = max(1, min(t_chunk_max, L))
    num_chunks = -(-L // t_chunk)
    L_pad = num_chunks * t_chunk
    rem_last = L - (num_chunks - 1) * t_chunk      # real steps in the last chunk (static)

    mxu_dtype = jnp.bfloat16 if use_bf16_weights else jnp.float32

    # ---- glue: fold the input projection into the embedding table ----
    # gx_t = emb[ids] @ W_ih + b = (emb @ W_ih + b)[ids]   (one small (V,E)@(E,4H) XLA matmul)
    emb_gates = _pad_gate_cols(emb @ w_ih + b, H, H_pad)                 # (V, 4*H_pad) f32
    gx = jnp.take(emb_gates, input_ids.reshape(-1), axis=0).reshape(L, B, 4 * H_pad)
    gx_p = jnp.pad(gx, ((0, L_pad - L), (0, B_pad - B), (0, 0)))

    if dec_hidden is None:
        h0 = jnp.zeros((B, H), jnp.float32)
        c0 = jnp.zeros((B, H), jnp.float32)
    else:
        h0 = dec_hidden[0].reshape(B, H)
        c0 = dec_hidden[1].reshape(B, H)
    h0_p = jnp.pad(h0, ((0, B_pad - B), (0, H_pad - H)))
    c0_p = jnp.pad(c0, ((0, B_pad - B), (0, H_pad - H)))

    w_hh_p = jnp.pad(_pad_gate_cols(w_hh, H, H_pad),
                     ((0, H_pad - H), (0, 0))).astype(mxu_dtype)
    w_proj_p = jnp.pad(w_proj, ((0, H_pad - H), (0, V_pad - V))).astype(mxu_dtype)
    b_proj_p = jnp.pad(b_proj, ((0, 0), (0, V_pad - V)))                 # (1, V_pad) f32

    # Fully unroll short chunks; partially unroll long ones (code-size vs overlap tradeoff).
    unroll = True if t_chunk <= 64 else 8

    kernel = functools.partial(_char_decoder_kernel,
                               t_chunk=t_chunk, b_pad=B_pad, h_pad=H_pad,
                               last_valid_row=rem_last - 1,
                               mxu_dtype=mxu_dtype, unroll=unroll)

    scores_p, hT, cT = pl.pallas_call(
        kernel,
        out_shape=(
            jax.ShapeDtypeStruct((L_pad, B_pad, V_pad), jnp.float32),
            jax.ShapeDtypeStruct((B_pad, H_pad), jnp.float32),
            jax.ShapeDtypeStruct((B_pad, H_pad), jnp.float32),
        ),
        grid_spec=pltpu.PrefetchScalarGridSpec(
            num_scalar_prefetch=0,
            grid=(num_chunks,),
            in_specs=[
                pl.BlockSpec((t_chunk, B_pad, 4 * H_pad), lambda c: (c, 0, 0)),  # gx chunk
                pl.BlockSpec((B_pad, H_pad), lambda c: (0, 0)),                  # h0
                pl.BlockSpec((B_pad, H_pad), lambda c: (0, 0)),                  # c0
                pl.BlockSpec((H_pad, 4 * H_pad), lambda c: (0, 0)),              # W_hh
                pl.BlockSpec((H_pad, V_pad), lambda c: (0, 0)),                  # W_proj
                pl.BlockSpec((1, V_pad), lambda c: (0, 0)),                      # b_proj
            ],
            out_specs=[
                pl.BlockSpec((t_chunk, B_pad, V_pad), lambda c: (c, 0, 0)),      # scores
                pl.BlockSpec((B_pad, H_pad), lambda c: (0, 0)),                  # h_n
                pl.BlockSpec((B_pad, H_pad), lambda c: (0, 0)),                  # c_n
            ],
            scratch_shapes=[
                pltpu.VMEM((B_pad, H_pad), jnp.float32),              # h carry across chunks
                pltpu.VMEM((B_pad, H_pad), jnp.float32),              # c carry across chunks
                pltpu.VMEM((t_chunk, B_pad, H_pad), jnp.float32),     # per-step h stash
                pltpu.VMEM((t_chunk, B_pad, H_pad), jnp.float32),     # per-step c stash
            ],
        ),
        compiler_params=pltpu.CompilerParams(
            dimension_semantics=("arbitrary",),          # recurrence is serial across chunks
            vmem_limit_bytes=48 * 1024 * 1024,           # fits v7x's 64 MiB with headroom
        ),
    )(gx_p, h0_p, c0_p, w_hh_p, w_proj_p, b_proj_p)

    scores = scores_p[:L, :B, :V]
    h_n = hT[:B, :H].reshape(1, B, H)
    c_n = cT[:B, :H].reshape(1, B, H)
    return scores, (h_n, c_n)


def _reference_forward(input_ids, params, dec_hidden=None):
    """Pure-JAX reference (mirrors torch nn.LSTM + nn.Linear semantics)."""
    emb, w_ih, w_hh, b = params["emb"], params["w_ih"], params["w_hh"], params["b"]
    w_proj, b_proj = params["w_proj"], params["b_proj"]
    L, B = input_ids.shape
    V, E = emb.shape
    H = w_hh.shape[0]
    x = jnp.take(emb, input_ids.reshape(-1), axis=0).reshape(L, B, E)
    if dec_hidden is None:
        h = jnp.zeros((B, H), jnp.float32)
        c = jnp.zeros((B, H), jnp.float32)
    else:
        h, c = dec_hidden[0].reshape(B, H), dec_hidden[1].reshape(B, H)

    def step(carry, x_t):
        h, c = carry
        g = x_t @ w_ih + h @ w_hh + b[0]
        i = jax.nn.sigmoid(g[:, :H])
        f = jax.nn.sigmoid(g[:, H:2 * H])
        gg = jnp.tanh(g[:, 2 * H:3 * H])
        o = jax.nn.sigmoid(g[:, 3 * H:])
        c = f * c + i * gg
        h = o * jnp.tanh(c)
        return (h, c), h @ w_proj + b_proj[0]

    (h, c), scores = jax.lax.scan(step, (h, c), x)
    return scores, (h[None], c[None])


def init_params(key, vocab_size, char_embedding_size, hidden_size, pad_idx=0):
    ks = jax.random.split(key, 7)
    E, H, V = char_embedding_size, hidden_size, vocab_size
    emb = 0.1 * jax.random.normal(ks[0], (V, E), jnp.float32)
    emb = emb.at[pad_idx].set(0.0)                      # padding_idx row is zero
    w_ih = 0.1 * jax.random.normal(ks[1], (E, 4 * H), jnp.float32)
    w_hh = 0.1 * jax.random.normal(ks[2], (H, 4 * H), jnp.float32)
    b_ih = 0.1 * jax.random.normal(ks[3], (4 * H,), jnp.float32)
    b_hh = 0.1 * jax.random.normal(ks[4], (4 * H,), jnp.float32)
    w_proj = 0.1 * jax.random.normal(ks[5], (H, V), jnp.float32)
    b_proj = 0.1 * jax.random.normal(ks[6], (V,), jnp.float32)
    return {
        "emb": emb,
        "w_ih": w_ih,
        "w_hh": w_hh,
        "b": (b_ih + b_hh).reshape(1, 4 * H),
        "w_proj": w_proj,
        "b_proj": b_proj.reshape(1, V),
    }


if __name__ == "__main__":
    # Small deterministic config: hidden=32, char_embedding_size=50 (module default), vocab=30
    L, B = 8, 2
    HIDDEN, EMB, VOCAB = 32, 50, 30

    key = jax.random.PRNGKey(0)
    k_par, k_ids, k_h, k_c = jax.random.split(key, 4)
    params = init_params(k_par, VOCAB, EMB, HIDDEN, pad_idx=0)

    input_ids = jax.random.randint(k_ids, (L, B), 0, VOCAB, dtype=jnp.int32)
    dec_hidden = (0.1 * jax.random.normal(k_h, (1, B, HIDDEN), jnp.float32),
                  0.1 * jax.random.normal(k_c, (1, B, HIDDEN), jnp.float32))

    ref_scores, (ref_h, ref_c) = _reference_forward(input_ids, params, dec_hidden)

    # ---- f32 path, single chunk: bit-for-bit-ish check against the reference ----
    scores, (h_n, c_n) = char_decoder_forward(input_ids, params, dec_hidden,
                                              use_bf16_weights=False)
    scores = jax.block_until_ready(scores)
    h_n = jax.block_until_ready(h_n)
    c_n = jax.block_until_ready(c_n)
    assert scores.shape == (L, B, VOCAB)
    assert h_n.shape == (1, B, HIDDEN) and c_n.shape == (1, B, HIDDEN)
    assert jnp.allclose(scores, ref_scores, atol=1e-5, rtol=1e-5)
    assert jnp.allclose(h_n, ref_h, atol=1e-5, rtol=1e-5)
    assert jnp.allclose(c_n, ref_c, atol=1e-5, rtol=1e-5)

    # ---- f32 path, multi-chunk with ragged last chunk (chunk-carry + final-state extraction) ----
    scores2, (h_n2, c_n2) = char_decoder_forward(input_ids, params, dec_hidden,
                                                 t_chunk_max=3, use_bf16_weights=False)
    scores2 = jax.block_until_ready(scores2)
    assert jnp.allclose(scores2, ref_scores, atol=1e-5, rtol=1e-5)
    assert jnp.allclose(h_n2, ref_h, atol=1e-5, rtol=1e-5)
    assert jnp.allclose(c_n2, ref_c, atol=1e-5, rtol=1e-5)

    # ---- default fast path (bf16 MXU operands, f32 accumulation / gate math) ----
    scores3, (h_n3, c_n3) = char_decoder_forward(input_ids, params, dec_hidden)
    scores3 = jax.block_until_ready(scores3)
    assert jnp.allclose(scores3, ref_scores, atol=5e-2)
    assert jnp.allclose(h_n3, ref_h, atol=5e-2)
    assert jnp.allclose(c_n3, ref_c, atol=5e-2)

    print("KERNEL_OK")
</pallas_src>

<mosaic_0001>
module attributes {stable_mosaic.version = 11 : i64} {
  func.func @_char_decoder_kernel(%arg0: i32, %arg1: memref<8x8x512xf32, #tpu.memory_space<vmem>>, %arg2: memref<8x128xf32, #tpu.memory_space<vmem>>, %arg3: memref<8x128xf32, #tpu.memory_space<vmem>>, %arg4: memref<128x512xf32, #tpu.memory_space<vmem>>, %arg5: memref<128x128xf32, #tpu.memory_space<vmem>>, %arg6: memref<1x128xf32, #tpu.memory_space<vmem>>, %arg7: memref<8x8x128xf32, #tpu.memory_space<vmem>>, %arg8: memref<8x128xf32, #tpu.memory_space<vmem>>, %arg9: memref<8x128xf32, #tpu.memory_space<vmem>>, %arg10: memref<8x128xf32, #tpu.memory_space<vmem>>, %arg11: memref<8x128xf32, #tpu.memory_space<vmem>>, %arg12: memref<8x8x128xf32, #tpu.memory_space<vmem>>, %arg13: memref<8x8x128xf32, #tpu.memory_space<vmem>>) attributes {dimension_semantics = [#tpu.dimension_semantics<arbitrary>], iteration_bounds = array<i64: 1>, scalar_prefetch = 0 : i64, scratch_operands = 4 : i64, tpu.core_type = #tpu.core_type<tc>, window_params = [{transform_indices = @transform_0, window_bounds = array<i64: 8, 8, 512>}, {pipeline_mode = #tpu.pipeline_mode<synchronous>, transform_indices = @transform_1, window_bounds = array<i64: 8, 128>}, {pipeline_mode = #tpu.pipeline_mode<synchronous>, transform_indices = @transform_2, window_bounds = array<i64: 8, 128>}, {pipeline_mode = #tpu.pipeline_mode<synchronous>, transform_indices = @transform_3, window_bounds = array<i64: 128, 512>}, {pipeline_mode = #tpu.pipeline_mode<synchronous>, transform_indices = @transform_4, window_bounds = array<i64: 128, 128>}, {pipeline_mode = #tpu.pipeline_mode<synchronous>, transform_indices = @transform_5, window_bounds = array<i64: 1, 128>}, {transform_indices = @transform_6, window_bounds = array<i64: 8, 8, 128>}, {pipeline_mode = #tpu.pipeline_mode<synchronous>, transform_indices = @transform_7, window_bounds = array<i64: 8, 128>}, {pipeline_mode = #tpu.pipeline_mode<synchronous>, transform_indices = @transform_8, window_bounds = array<i64: 8, 128>}]} {
    %c0_i32 = arith.constant 0 : i32
    %0 = arith.cmpi eq, %arg0, %c0_i32 : i32
    %1 = arith.extui %0 : i1 to i32
    %c0_i32_0 = arith.constant 0 : i32
    %2 = arith.cmpi ne, %1, %c0_i32_0 : i32
    scf.if %2 {
      %c0_117 = arith.constant 0 : index
      %c0_118 = arith.constant 0 : index
      %331 = vector.load %arg2[%c0_117, %c0_118] : memref<8x128xf32, #tpu.memory_space<vmem>>, vector<8x128xf32>
      %c0_119 = arith.constant 0 : index
      %c0_120 = arith.constant 0 : index
      %332 = vector.load %arg10[%c0_119, %c0_120] : memref<8x128xf32, #tpu.memory_space<vmem>>, vector<8x128xf32>
      tpu.vector_store %arg10[%c0_119, %c0_120], %331 {strides = array<i32>} : memref<8x128xf32, #tpu.memory_space<vmem>>, vector<8x128xf32>,
      %c0_121 = arith.constant 0 : index
      %c0_122 = arith.constant 0 : index
      %333 = vector.load %arg3[%c0_121, %c0_122] : memref<8x128xf32, #tpu.memory_space<vmem>>, vector<8x128xf32>
      %c0_123 = arith.constant 0 : index
      %c0_124 = arith.constant 0 : index
      %334 = vector.load %arg11[%c0_123, %c0_124] : memref<8x128xf32, #tpu.memory_space<vmem>>, vector<8x128xf32>
      tpu.vector_store %arg11[%c0_123, %c0_124], %333 {strides = array<i32>} : memref<8x128xf32, #tpu.memory_space<vmem>>, vector<8x128xf32>,
    } else {
    }
    %c0 = arith.constant 0 : index
    %c0_1 = arith.constant 0 : index
    %3 = vector.load %arg10[%c0, %c0_1] : memref<8x128xf32, #tpu.memory_space<vmem>>, vector<8x128xf32>
    %c0_2 = arith.constant 0 : index
    %c0_3 = arith.constant 0 : index
    %4 = vector.load %arg11[%c0_2, %c0_3] : memref<8x128xf32, #tpu.memory_space<vmem>>, vector<8x128xf32>
    %c0_i32_4 = arith.constant 0 : i32
    %5 = arith.index_cast %c0_i32_4 : i32 to index
    %c0_5 = arith.constant 0 : index
    %c0_6 = arith.constant 0 : index
    %6 = vector.load %arg1[%5, %c0_5, %c0_6] : memref<8x8x512xf32, #tpu.memory_space<vmem>>, vector<1x8x512xf32>
    %7 = vector.shape_cast %6 : vector<1x8x512xf32> to vector<8x512xf32>
    %c0_7 = arith.constant 0 : index
    %c0_8 = arith.constant 0 : index
    %8 = vector.load %arg4[%c0_7, %c0_8] : memref<128x512xf32, #tpu.memory_space<vmem>>, vector<128x512xf32>
    %cst = arith.constant dense<0.000000e+00> : vector<8x512xf32>
    %9 = tpu.matmul %3, %8, %cst {dimension_numbers = #tpu.dot_dimension_numbers<[1], [0], [0], [1], [0, 0, 1, 1], [], []>} : vector<8x128xf32>, vector<128x512xf32>, vector<8x512xf32> -> vector<8x512xf32>
    %10 = arith.addf %7, %9 : vector<8x512xf32>
    %11 = vector.extract_strided_slice %10 {offsets = [0, 0], sizes = [8, 128], strides = [1, 1]} : vector<8x512xf32> to vector<8x128xf32>
    %12 = arith.negf %11 : vector<8x128xf32>
    %13 = math.exp %12 : vector<8x128xf32>
    %cst_9 = arith.constant 1.000000e+00 : f32
    %14 = vector.broadcast %cst_9 : f32 to vector<8x128xf32>
    %15 = arith.addf %14, %13 : vector<8x128xf32>
    %16 = arith.divf %14, %15 : vector<8x128xf32>
    %17 = vector.extract_strided_slice %10 {offsets = [0, 128], sizes = [8, 128], strides = [1, 1]} : vector<8x512xf32> to vector<8x128xf32>
    %18 = arith.negf %17 : vector<8x128xf32>
    %19 = math.exp %18 : vector<8x128xf32>
    %cst_10 = arith.constant 1.000000e+00 : f32
    %20 = vector.broadcast %cst_10 : f32 to vector<8x128xf32>
    %21 = arith.addf %20, %19 : vector<8x128xf32>
    %22 = arith.divf %20, %21 : vector<8x128xf32>
    %23 = vector.extract_strided_slice %10 {offsets = [0, 256], sizes = [8, 128], strides = [1, 1]} : vector<8x512xf32> to vector<8x128xf32>
    %24 = math.tanh %23 : vector<8x128xf32>
    %25 = vector.extract_strided_slice %10 {offsets = [0, 384], sizes = [8, 128], strides = [1, 1]} : vector<8x512xf32> to vector<8x128xf32>
    %26 = arith.negf %25 : vector<8x128xf32>
    %27 = math.exp %26 : vector<8x128xf32>
    %cst_11 = arith.constant 1.000000e+00 : f32
    %28 = vector.broadcast %cst_11 : f32 to vector<8x128xf32>
    %29 = arith.addf %28, %27 : vector<8x128xf32>
    %30 = arith.divf %28, %29 : vector<8x128xf32>
    %31 = arith.mulf %22, %4 : vector<8x128xf32>
    %32 = arith.mulf %16, %24 : vector<8x128xf32>
    %33 = arith.addf %31, %32 : vector<8x128xf32>
    %34 = math.tanh %33 : vector<8x128xf32>
    %35 = arith.mulf %30, %34 : vector<8x128xf32>
    %36 = arith.index_cast %c0_i32_4 : i32 to index
    %c0_12 = arith.constant 0 : index
    %c0_13 = arith.constant 0 : index
    %37 = vector.load %arg12[%36, %c0_12, %c0_13] : memref<8x8x128xf32, #tpu.memory_space<vmem>>, vector<1x8x128xf32>
    %38 = vector.shape_cast %37 : vector<1x8x128xf32> to vector<8x128xf32>
    %39 = vector.shape_cast %35 : vector<8x128xf32> to vector<1x8x128xf32>
    tpu.vector_store %arg12[%36, %c0_12, %c0_13], %39 {strides = array<i32>} : memref<8x8x128xf32, #tpu.memory_space<vmem>>, vector<1x8x128xf32>,
    %40 = arith.index_cast %c0_i32_4 : i32 to index
    %c0_14 = arith.constant 0 : index
    %c0_15 = arith.constant 0 : index
    %41 = vector.load %arg13[%40, %c0_14, %c0_15] : memref<8x8x128xf32, #tpu.memory_space<vmem>>, vector<1x8x128xf32>
    %42 = vector.shape_cast %41 : vector<1x8x128xf32> to vector<8x128xf32>
    %43 = vector.shape_cast %33 : vector<8x128xf32> to vector<1x8x128xf32>
    tpu.vector_store %arg13[%40, %c0_14, %c0_15], %43 {strides = array<i32>} : memref<8x8x128xf32, #tpu.memory_space<vmem>>, vector<1x8x128xf32>,
    %c1_i32 = arith.constant 1 : i32
    %44 = arith.index_cast %c1_i32 : i32 to index
    %c0_16 = arith.constant 0 : index
    %c0_17 = arith.constant 0 : index
    %45 = vector.load %arg1[%44, %c0_16, %c0_17] : memref<8x8x512xf32, #tpu.memory_space<vmem>>, vector<1x8x512xf32>
    %46 = vector.shape_cast %45 : vector<1x8x512xf32> to vector<8x512xf32>
    %c0_18 = arith.constant 0 : index
    %c0_19 = arith.constant 0 : index
    %47 = vector.load %arg4[%c0_18, %c0_19] : memref<128x512xf32, #tpu.memory_space<vmem>>, vector<128x512xf32>
    %cst_20 = arith.constant dense<0.000000e+00> : vector<8x512xf32>
    %48 = tpu.matmul %35, %47, %cst_20 {dimension_numbers = #tpu.dot_dimension_numbers<[1], [0], [0], [1], [0, 0, 1, 1], [], []>} : vector<8x128xf32>, vector<128x512xf32>, vector<8x512xf32> -> vector<8x512xf32>
    %49 = arith.addf %46, %48 : vector<8x512xf32>
    %50 = vector.extract_strided_slice %49 {offsets = [0, 0], sizes = [8, 128], strides = [1, 1]} : vector<8x512xf32> to vector<8x128xf32>
    %51 = arith.negf %50 : vector<8x128xf32>
    %52 = math.exp %51 : vector<8x128xf32>
    %cst_21 = arith.constant 1.000000e+00 : f32
    %53 = vector.broadcast %cst_21 : f32 to vector<8x128xf32>
    %54 = arith.addf %53, %52 : vector<8x128xf32>
    %55 = arith.divf %53, %54 : vector<8x128xf32>
    %56 = vector.extract_strided_slice %49 {offsets = [0, 128], sizes = [8, 128], strides = [1, 1]} : vector<8x512xf32> to vector<8x128xf32>
    %57 = arith.negf %56 : vector<8x128xf32>
    %58 = math.exp %57 : vector<8x128xf32>
    %cst_22 = arith.constant 1.000000e+00 : f32
    %59 = vector.broadcast %cst_22 : f32 to vector<8x128xf32>
    %60 = arith.addf %59, %58 : vector<8x128xf32>
    %61 = arith.divf %59, %60 : vector<8x128xf32>
    %62 = vector.extract_strided_slice %49 {offsets = [0, 256], sizes = [8, 128], strides = [1, 1]} : vector<8x512xf32> to vector<8x128xf32>
    %63 = math.tanh %62 : vector<8x128xf32>
    %64 = vector.extract_strided_slice %49 {offsets = [0, 384], sizes = [8, 128], strides = [1, 1]} : vector<8x512xf32> to vector<8x128xf32>
    %65 = arith.negf %64 : vector<8x128xf32>
    %66 = math.exp %65 : vector<8x128xf32>
    %cst_23 = arith.constant 1.000000e+00 : f32
    %67 = vector.broadcast %cst_23 : f32 to vector<8x128xf32>
    %68 = arith.addf %67, %66 : vector<8x128xf32>
    %69 = arith.divf %67, %68 : vector<8x128xf32>
    %70 = arith.mulf %61, %33 : vector<8x128xf32>
    %71 = arith.mulf %55, %63 : vector<8x128xf32>
    %72 = arith.addf %70, %71 : vector<8x128xf32>
    %73 = math.tanh %72 : vector<8x128xf32>
    %74 = arith.mulf %69, %73 : vector<8x128xf32>
    %75 = arith.index_cast %c1_i32 : i32 to index
    %c0_24 = arith.constant 0 : index
    %c0_25 = arith.constant 0 : index
    %76 = vector.load %arg12[%75, %c0_24, %c0_25] : memref<8x8x128xf32, #tpu.memory_space<vmem>>, vector<1x8x128xf32>
    %77 = vector.shape_cast %76 : vector<1x8x128xf32> to vector<8x128xf32>
    %78 = vector.shape_cast %74 : vector<8x128xf32> to vector<1x8x128xf32>
    tpu.vector_store %arg12[%75, %c0_24, %c0_25], %78 {strides = array<i32>} : memref<8x8x128xf32, #tpu.memory_space<vmem>>, vector<1x8x128xf32>,
    %79 = arith.index_cast %c1_i32 : i32 to index
    %c0_26 = arith.constant 0 : index
    %c0_27 = arith.constant 0 : index
    %80 = vector.load %arg13[%79, %c0_26, %c0_27] : memref<8x8x128xf32, #tpu.memory_space<vmem>>, vector<1x8x128xf32>
    %81 = vector.shape_cast %80 : vector<1x8x128xf32> to vector<8x128xf32>
    %82 = vector.shape_cast %72 : vector<8x128xf32> to vector<1x8x128xf32>
    tpu.vector_store %arg13[%79, %c0_26, %c0_27], %82 {strides = array<i32>} : memref<8x8x128xf32, #tpu.memory_space<vmem>>, vector<1x8x128xf32>,
    %c2_i32 = arith.constant 2 : i32
    %83 = arith.index_cast %c2_i32 : i32 to index
    %c0_28 = arith.constant 0 : index
    %c0_29 = arith.constant 0 : index
    %84 = vector.load %arg1[%83, %c0_28, %c0_29] : memref<8x8x512xf32, #tpu.memory_space<vmem>>, vector<1x8x512xf32>
    %85 = vector.shape_cast %84 : vector<1x8x512xf32> to vector<8x512xf32>
    %c0_30 = arith.constant 0 : index
    %c0_31 = arith.constant 0 : index
    %86 = vector.load %arg4[%c0_30, %c0_31] : memref<128x512xf32, #tpu.memory_space<vmem>>, vector<128x512xf32>
    %cst_32 = arith.constant dense<0.000000e+00> : vector<8x512xf32>
    %87 = tpu.matmul %74, %86, %cst_32 {dimension_numbers = #tpu.dot_dimension_numbers<[1], [0], [0], [1], [0, 0, 1, 1], [], []>} : vector<8x128xf32>, vector<128x512xf32>, vector<8x512xf32> -> vector<8x512xf32>
    %88 = arith.addf %85, %87 : vector<8x512xf32>
    %89 = vector.extract_strided_slice %88 {offsets = [0, 0], sizes = [8, 128], strides = [1, 1]} : vector<8x512xf32> to vector<8x128xf32>
    %90 = arith.negf %89 : vector<8x128xf32>
    %91 = math.exp %90 : vector<8x128xf32>
    %cst_33 = arith.constant 1.000000e+00 : f32
    %92 = vector.broadcast %cst_33 : f32 to vector<8x128xf32>
    %93 = arith.addf %92, %91 : vector<8x128xf32>
    %94 = arith.divf %92, %93 : vector<8x128xf32>
    %95 = vector.extract_strided_slice %88 {offsets = [0, 128], sizes = [8, 128], strides = [1, 1]} : vector<8x512xf32> to vector<8x128xf32>
    %96 = arith.negf %95 : vector<8x128xf32>
    %97 = math.exp %96 : vector<8x128xf32>
    %cst_34 = arith.constant 1.000000e+00 : f32
    %98 = vector.broadcast %cst_34 : f32 to vector<8x128xf32>
    %99 = arith.addf %98, %97 : vector<8x128xf32>
    %100 = arith.divf %98, %99 : vector<8x128xf32>
    %101 = vector.extract_strided_slice %88 {offsets = [0, 256], sizes = [8, 128], strides = [1, 1]} : vector<8x512xf32> to vector<8x128xf32>
    %102 = math.tanh %101 : vector<8x128xf32>
    %103 = vector.extract_strided_slice %88 {offsets = [0, 384], sizes = [8, 128], strides = [1, 1]} : vector<8x512xf32> to vector<8x128xf32>
    %104 = arith.negf %103 : vector<8x128xf32>
    %105 = math.exp %104 : vector<8x128xf32>
    %cst_35 = arith.constant 1.000000e+00 : f32
    %106 = vector.broadcast %cst_35 : f32 to vector<8x128xf32>
    %107 = arith.addf %106, %105 : vector<8x128xf32>
    %108 = arith.divf %106, %107 : vector<8x128xf32>
    %109 = arith.mulf %100, %72 : vector<8x128xf32>
    %110 = arith.mulf %94, %102 : vector<8x128xf32>
    %111 = arith.addf %109, %110 : vector<8x128xf32>
    %112 = math.tanh %111 : vector<8x128xf32>
    %113 = arith.mulf %108, %112 : vector<8x128xf32>
    %114 = arith.index_cast %c2_i32 : i32 to index
    %c0_36 = arith.constant 0 : index
    %c0_37 = arith.constant 0 : index
    %115 = vector.load %arg12[%114, %c0_36, %c0_37] : memref<8x8x128xf32, #tpu.memory_space<vmem>>, vector<1x8x128xf32>
    %116 = vector.shape_cast %115 : vector<1x8x128xf32> to vector<8x128xf32>
    %117 = vector.shape_cast %113 : vector<8x128xf32> to vector<1x8x128xf32>
    tpu.vector_store %arg12[%114, %c0_36, %c0_37], %117 {strides = array<i32>} : memref<8x8x128xf32, #tpu.memory_space<vmem>>, vector<1x8x128xf32>,
    %118 = arith.index_cast %c2_i32 : i32 to index
    %c0_38 = arith.constant 0 : index
    %c0_39 = arith.constant 0 : index
    %119 = vector.load %arg13[%118, %c0_38, %c0_39] : memref<8x8x128xf32, #tpu.memory_space<vmem>>, vector<1x8x128xf32>
    %120 = vector.shape_cast %119 : vector<1x8x128xf32> to vector<8x128xf32>
    %121 = vector.shape_cast %111 : vector<8x128xf32> to vector<1x8x128xf32>
    tpu.vector_store %arg13[%118, %c0_38, %c0_39], %121 {strides = array<i32>} : memref<8x8x128xf32, #tpu.memory_space<vmem>>, vector<1x8x128xf32>,
    %c3_i32 = arith.constant 3 : i32
    %122 = arith.index_cast %c3_i32 : i32 to index
    %c0_40 = arith.constant 0 : index
    %c0_41 = arith.constant 0 : index
    %123 = vector.load %arg1[%122, %c0_40, %c0_41] : memref<8x8x512xf32, #tpu.memory_space<vmem>>, vector<1x8x512xf32>
    %124 = vector.shape_cast %123 : vector<1x8x512xf32> to vector<8x512xf32>
    %c0_42 = arith.constant 0 : index
    %c0_43 = arith.constant 0 : index
    %125 = vector.load %arg4[%c0_42, %c0_43] : memref<128x512xf32, #tpu.memory_space<vmem>>, vector<128x512xf32>
    %cst_44 = arith.constant dense<0.000000e+00> : vector<8x512xf32>
    %126 = tpu.matmul %113, %125, %cst_44 {dimension_numbers = #tpu.dot_dimension_numbers<[1], [0], [0], [1], [0, 0, 1, 1], [], []>} : vector<8x128xf32>, vector<128x512xf32>, vector<8x512xf32> -> vector<8x512xf32>
    %127 = arith.addf %124, %126 : vector<8x512xf32>
    %128 = vector.extract_strided_slice %127 {offsets = [0, 0], sizes = [8, 128], strides = [1, 1]} : vector<8x512xf32> to vector<8x128xf32>
    %129 = arith.negf %128 : vector<8x128xf32>
    %130 = math.exp %129 : vector<8x128xf32>
    %cst_45 = arith.constant 1.000000e+00 : f32
    %131 = vector.broadcast %cst_45 : f32 to vector<8x128xf32>
    %132 = arith.addf %131, %130 : vector<8x128xf32>
    %133 = arith.divf %131, %132 : vector<8x128xf32>
    %134 = vector.extract_strided_slice %127 {offsets = [0, 128], sizes = [8, 128], strides = [1, 1]} : vector<8x512xf32> to vector<8x128xf32>
    %135 = arith.negf %134 : vector<8x128xf32>
    %136 = math.exp %135 : vector<8x128xf32>
    %cst_46 = arith.constant 1.000000e+00 : f32
    %137 = vector.broadcast %cst_46 : f32 to vector<8x128xf32>
    %138 = arith.addf %137, %136 : vector<8x128xf32>
    %139 = arith.divf %137, %138 : vector<8x128xf32>
    %140 = vector.extract_strided_slice %127 {offsets = [0, 256], sizes = [8, 128], strides = [1, 1]} : vector<8x512xf32> to vector<8x128xf32>
    %141 = math.tanh %140 : vector<8x128xf32>
    %142 = vector.extract_strided_slice %127 {offsets = [0, 384], sizes = [8, 128], strides = [1, 1]} : vector<8x512xf32> to vector<8x128xf32>
    %143 = arith.negf %142 : vector<8x128xf32>
    %144 = math.exp %143 : vector<8x128xf32>
    %cst_47 = arith.constant 1.000000e+00 : f32
    %145 = vector.broadcast %cst_47 : f32 to vector<8x128xf32>
    %146 = arith.addf %145, %144 : vector<8x128xf32>
    %147 = arith.divf %145, %146 : vector<8x128xf32>
    %148 = arith.mulf %139, %111 : vector<8x128xf32>
    %149 = arith.mulf %133, %141 : vector<8x128xf32>
    %150 = arith.addf %148, %149 : vector<8x128xf32>
    %151 = math.tanh %150 : vector<8x128xf32>
    %152 = arith.mulf %147, %151 : vector<8x128xf32>
    %153 = arith.index_cast %c3_i32 : i32 to index
    %c0_48 = arith.constant 0 : index
    %c0_49 = arith.constant 0 : index
    %154 = vector.load %arg12[%153, %c0_48, %c0_49] : memref<8x8x128xf32, #tpu.memory_space<vmem>>, vector<1x8x128xf32>
    %155 = vector.shape_cast %154 : vector<1x8x128xf32> to vector<8x128xf32>
    %156 = vector.shape_cast %152 : vector<8x128xf32> to vector<1x8x128xf32>
    tpu.vector_store %arg12[%153, %c0_48, %c0_49], %156 {strides = array<i32>} : memref<8x8x128xf32, #tpu.memory_space<vmem>>, vector<1x8x128xf32>,
    %157 = arith.index_cast %c3_i32 : i32 to index
    %c0_50 = arith.constant 0 : index
    %c0_51 = arith.constant 0 : index
    %158 = vector.load %arg13[%157, %c0_50, %c0_51] : memref<8x8x128xf32, #tpu.memory_space<vmem>>, vector<1x8x128xf32>
    %159 = vector.shape_cast %158 : vector<1x8x128xf32> to vector<8x128xf32>
    %160 = vector.shape_cast %150 : vector<8x128xf32> to vector<1x8x128xf32>
    tpu.vector_store %arg13[%157, %c0_50, %c0_51], %160 {strides = array<i32>} : memref<8x8x128xf32, #tpu.memory_space<vmem>>, vector<1x8x128xf32>,
    %c4_i32 = arith.constant 4 : i32
    %161 = arith.index_cast %c4_i32 : i32 to index
    %c0_52 = arith.constant 0 : index
    %c0_53 = arith.constant 0 : index
    %162 = vector.load %arg1[%161, %c0_52, %c0_53] : memref<8x8x512xf32, #tpu.memory_space<vmem>>, vector<1x8x512xf32>
    %163 = vector.shape_cast %162 : vector<1x8x512xf32> to vector<8x512xf32>
    %c0_54 = arith.constant 0 : index
    %c0_55 = arith.constant 0 : index
    %164 = vector.load %arg4[%c0_54, %c0_55] : memref<128x512xf32, #tpu.memory_space<vmem>>, vector<128x512xf32>
    %cst_56 = arith.constant dense<0.000000e+00> : vector<8x512xf32>
    %165 = tpu.matmul %152, %164, %cst_56 {dimension_numbers = #tpu.dot_dimension_numbers<[1], [0], [0], [1], [0, 0, 1, 1], [], []>} : vector<8x128xf32>, vector<128x512xf32>, vector<8x512xf32> -> vector<8x512xf32>
    %166 = arith.addf %163, %165 : vector<8x512xf32>
    %167 = vector.extract_strided_slice %166 {offsets = [0, 0], sizes = [8, 128], strides = [1, 1]} : vector<8x512xf32> to vector<8x128xf32>
    %168 = arith.negf %167 : vector<8x128xf32>
    %169 = math.exp %168 : vector<8x128xf32>
    %cst_57 = arith.constant 1.000000e+00 : f32
    %170 = vector.broadcast %cst_57 : f32 to vector<8x128xf32>
    %171 = arith.addf %170, %169 : vector<8x128xf32>
    %172 = arith.divf %170, %171 : vector<8x128xf32>
    %173 = vector.extract_strided_slice %166 {offsets = [0, 128], sizes = [8, 128], strides = [1, 1]} : vector<8x512xf32> to vector<8x128xf32>
    %174 = arith.negf %173 : vector<8x128xf32>
    %175 = math.exp %174 : vector<8x128xf32>
    %cst_58 = arith.constant 1.000000e+00 : f32
    %176 = vector.broadcast %cst_58 : f32 to vector<8x128xf32>
    %177 = arith.addf %176, %175 : vector<8x128xf32>
    %178 = arith.divf %176, %177 : vector<8x128xf32>
    %179 = vector.extract_strided_slice %166 {offsets = [0, 256], sizes = [8, 128], strides = [1, 1]} : vector<8x512xf32> to vector<8x128xf32>
    %180 = math.tanh %179 : vector<8x128xf32>
    %181 = vector.extract_strided_slice %166 {offsets = [0, 384], sizes = [8, 128], strides = [1, 1]} : vector<8x512xf32> to vector<8x128xf32>
    %182 = arith.negf %181 : vector<8x128xf32>
    %183 = math.exp %182 : vector<8x128xf32>
    %cst_59 = arith.constant 1.000000e+00 : f32
    %184 = vector.broadcast %cst_59 : f32 to vector<8x128xf32>
    %185 = arith.addf %184, %183 : vector<8x128xf32>
    %186 = arith.divf %184, %185 : vector<8x128xf32>
    %187 = arith.mulf %178, %150 : vector<8x128xf32>
    %188 = arith.mulf %172, %180 : vector<8x128xf32>
    %189 = arith.addf %187, %188 : vector<8x128xf32>
    %190 = math.tanh %189 : vector<8x128xf32>
    %191 = arith.mulf %186, %190 : vector<8x128xf32>
    %192 = arith.index_cast %c4_i32 : i32 to index
    %c0_60 = arith.constant 0 : index
    %c0_61 = arith.constant 0 : index
    %193 = vector.load %arg12[%192, %c0_60, %c0_61] : memref<8x8x128xf32, #tpu.memory_space<vmem>>, vector<1x8x128xf32>
    %194 = vector.shape_cast %193 : vector<1x8x128xf32> to vector<8x128xf32>
    %195 = vector.shape_cast %191 : vector<8x128xf32> to vector<1x8x128xf32>
    tpu.vector_store %arg12[%192, %c0_60, %c0_61], %195 {strides = array<i32>} : memref<8x8x128xf32, #tpu.memory_space<vmem>>, vector<1x8x128xf32>,
    %196 = arith.index_cast %c4_i32 : i32 to index
    %c0_62 = arith.constant 0 : index
    %c0_63 = arith.constant 0 : index
    %197 = vector.load %arg13[%196, %c0_62, %c0_63] : memref<8x8x128xf32, #tpu.memory_space<vmem>>, vector<1x8x128xf32>
    %198 = vector.shape_cast %197 : vector<1x8x128xf32> to vector<8x128xf32>
    %199 = vector.shape_cast %189 : vector<8x128xf32> to vector<1x8x128xf32>
    tpu.vector_store %arg13[%196, %c0_62, %c0_63], %199 {strides = array<i32>} : memref<8x8x128xf32, #tpu.memory_space<vmem>>, vector<1x8x128xf32>,
    %c5_i32 = arith.constant 5 : i32
    %200 = arith.index_cast %c5_i32 : i32 to index
    %c0_64 = arith.constant 0 : index
    %c0_65 = arith.constant 0 : index
    %201 = vector.load %arg1[%200, %c0_64, %c0_65] : memref<8x8x512xf32, #tpu.memory_space<vmem>>, vector<1x8x512xf32>
    %202 = vector.shape_cast %201 : vector<1x8x512xf32> to vector<8x512xf32>
    %c0_66 = arith.constant 0 : index
    %c0_67 = arith.constant 0 : index
    %203 = vector.load %arg4[%c0_66, %c0_67] : memref<128x512xf32, #tpu.memory_space<vmem>>, vector<128x512xf32>
    %cst_68 = arith.constant dense<0.000000e+00> : vector<8x512xf32>
    %204 = tpu.matmul %191, %203, %cst_68 {dimension_numbers = #tpu.dot_dimension_numbers<[1], [0], [0], [1], [0, 0, 1, 1], [], []>} : vector<8x128xf32>, vector<128x512xf32>, vector<8x512xf32> -> vector<8x512xf32>
    %205 = arith.addf %202, %204 : vector<8x512xf32>
    %206 = vector.extract_strided_slice %205 {offsets = [0, 0], sizes = [8, 128], strides = [1, 1]} : vector<8x512xf32> to vector<8x128xf32>
    %207 = arith.negf %206 : vector<8x128xf32>
    %208 = math.exp %207 : vector<8x128xf32>
    %cst_69 = arith.constant 1.000000e+00 : f32
    %209 = vector.broadcast %cst_69 : f32 to vector<8x128xf32>
    %210 = arith.addf %209, %208 : vector<8x128xf32>
    %211 = arith.divf %209, %210 : vector<8x128xf32>
    %212 = vector.extract_strided_slice %205 {offsets = [0, 128], sizes = [8, 128], strides = [1, 1]} : vector<8x512xf32> to vector<8x128xf32>
    %213 = arith.negf %212 : vector<8x128xf32>
    %214 = math.exp %213 : vector<8x128xf32>
    %cst_70 = arith.constant 1.000000e+00 : f32
    %215 = vector.broadcast %cst_70 : f32 to vector<8x128xf32>
    %216 = arith.addf %215, %214 : vector<8x128xf32>
    %217 = arith.divf %215, %216 : vector<8x128xf32>
    %218 = vector.extract_strided_slice %205 {offsets = [0, 256], sizes = [8, 128], strides = [1, 1]} : vector<8x512xf32> to vector<8x128xf32>
    %219 = math.tanh %218 : vector<8x128xf32>
    %220 = vector.extract_strided_slice %205 {offsets = [0, 384], sizes = [8, 128], strides = [1, 1]} : vector<8x512xf32> to vector<8x128xf32>
    %221 = arith.negf %220 : vector<8x128xf32>
    %222 = math.exp %221 : vector<8x128xf32>
    %cst_71 = arith.constant 1.000000e+00 : f32
    %223 = vector.broadcast %cst_71 : f32 to vector<8x128xf32>
    %224 = arith.addf %223, %222 : vector<8x128xf32>
    %225 = arith.divf %223, %224 : vector<8x128xf32>
    %226 = arith.mulf %217, %189 : vector<8x128xf32>
    %227 = arith.mulf %211, %219 : vector<8x128xf32>
    %228 = arith.addf %226, %227 : vector<8x128xf32>
    %229 = math.tanh %228 : vector<8x128xf32>
    %230 = arith.mulf %225, %229 : vector<8x128xf32>
    %231 = arith.index_cast %c5_i32 : i32 to index
    %c0_72 = arith.constant 0 : index
    %c0_73 = arith.constant 0 : index
    %232 = vector.load %arg12[%231, %c0_72, %c0_73] : memref<8x8x128xf32, #tpu.memory_space<vmem>>, vector<1x8x128xf32>
    %233 = vector.shape_cast %232 : vector<1x8x128xf32> to vector<8x128xf32>
    %234 = vector.shape_cast %230 : vector<8x128xf32> to vector<1x8x128xf32>
    tpu.vector_store %arg12[%231, %c0_72, %c0_73], %234 {strides = array<i32>} : memref<8x8x128xf32, #tpu.memory_space<vmem>>, vector<1x8x128xf32>,
    %235 = arith.index_cast %c5_i32 : i32 to index
    %c0_74 = arith.constant 0 : index
    %c0_75 = arith.constant 0 : index
    %236 = vector.load %arg13[%235, %c0_74, %c0_75] : memref<8x8x128xf32, #tpu.memory_space<vmem>>, vector<1x8x128xf32>
    %237 = vector.shape_cast %236 : vector<1x8x128xf32> to vector<8x128xf32>
    %238 = vector.shape_cast %228 : vector<8x128xf32> to vector<1x8x128xf32>
    tpu.vector_store %arg13[%235, %c0_74, %c0_75], %238 {strides = array<i32>} : memref<8x8x128xf32, #tpu.memory_space<vmem>>, vector<1x8x128xf32>,
    %c6_i32 = arith.constant 6 : i32
    %239 = arith.index_cast %c6_i32 : i32 to index
    %c0_76 = arith.constant 0 : index
    %c0_77 = arith.constant 0 : index
    %240 = vector.load %arg1[%239, %c0_76, %c0_77] : memref<8x8x512xf32, #tpu.memory_space<vmem>>, vector<1x8x512xf32>
    %241 = vector.shape_cast %240 : vector<1x8x512xf32> to vector<8x512xf32>
    %c0_78 = arith.constant 0 : index
    %c0_79 = arith.constant 0 : index
    %242 = vector.load %arg4[%c0_78, %c0_79] : memref<128x512xf32, #tpu.memory_space<vmem>>, vector<128x512xf32>
    %cst_80 = arith.constant dense<0.000000e+00> : vector<8x512xf32>
    %243 = tpu.matmul %230, %242, %cst_80 {dimension_numbers = #tpu.dot_dimension_numbers<[1], [0], [0], [1], [0, 0, 1, 1], [], []>} : vector<8x128xf32>, vector<128x512xf32>, vector<8x512xf32> -> vector<8x512xf32>
    %244 = arith.addf %241, %243 : vector<8x512xf32>
    %245 = vector.extract_strided_slice %244 {offsets = [0, 0], sizes = [8, 128], strides = [1, 1]} : vector<8x512xf32> to vector<8x128xf32>
    %246 = arith.negf %245 : vector<8x128xf32>
    %247 = math.exp %246 : vector<8x128xf32>
    %cst_81 = arith.constant 1.000000e+00 : f32
    %248 = vector.broadcast %cst_81 : f32 to vector<8x128xf32>
    %249 = arith.addf %248, %247 : vector<8x128xf32>
    %250 = arith.divf %248, %249 : vector<8x128xf32>
    %251 = vector.extract_strided_slice %244 {offsets = [0, 128], sizes = [8, 128], strides = [1, 1]} : vector<8x512xf32> to vector<8x128xf32>
    %252 = arith.negf %251 : vector<8x128xf32>
    %253 = math.exp %252 : vector<8x128xf32>
    %cst_82 = arith.constant 1.000000e+00 : f32
    %254 = vector.broadcast %cst_82 : f32 to vector<8x128xf32>
    %255 = arith.addf %254, %253 : vector<8x128xf32>
    %256 = arith.divf %254, %255 : vector<8x128xf32>
    %257 = vector.extract_strided_slice %244 {offsets = [0, 256], sizes = [8, 128], strides = [1, 1]} : vector<8x512xf32> to vector<8x128xf32>
    %258 = math.tanh %257 : vector<8x128xf32>
    %259 = vector.extract_strided_slice %244 {offsets = [0, 384], sizes = [8, 128], strides = [1, 1]} : vector<8x512xf32> to vector<8x128xf32>
    %260 = arith.negf %259 : vector<8x128xf32>
    %261 = math.exp %260 : vector<8x128xf32>
    %cst_83 = arith.constant 1.000000e+00 : f32
    %262 = vector.broadcast %cst_83 : f32 to vector<8x128xf32>
    %263 = arith.addf %262, %261 : vector<8x128xf32>
    %264 = arith.divf %262, %263 : vector<8x128xf32>
    %265 = arith.mulf %256, %228 : vector<8x128xf32>
    %266 = arith.mulf %250, %258 : vector<8x128xf32>
    %267 = arith.addf %265, %266 : vector<8x128xf32>
    %268 = math.tanh %267 : vector<8x128xf32>
    %269 = arith.mulf %264, %268 : vector<8x128xf32>
    %270 = arith.index_cast %c6_i32 : i32 to index
    %c0_84 = arith.constant 0 : index
    %c0_85 = arith.constant 0 : index
    %271 = vector.load %arg12[%270, %c0_84, %c0_85] : memref<8x8x128xf32, #tpu.memory_space<vmem>>, vector<1x8x128xf32>
    %272 = vector.shape_cast %271 : vector<1x8x128xf32> to vector<8x128xf32>
    %273 = vector.shape_cast %269 : vector<8x128xf32> to vector<1x8x128xf32>
    tpu.vector_store %arg12[%270, %c0_84, %c0_85], %273 {strides = array<i32>} : memref<8x8x128xf32, #tpu.memory_space<vmem>>, vector<1x8x128xf32>,
    %274 = arith.index_cast %c6_i32 : i32 to index
    %c0_86 = arith.constant 0 : index
    %c0_87 = arith.constant 0 : index
    %275 = vector.load %arg13[%274, %c0_86, %c0_87] : memref<8x8x128xf32, #tpu.memory_space<vmem>>, vector<1x8x128xf32>
    %276 = vector.shape_cast %275 : vector<1x8x128xf32> to vector<8x128xf32>
    %277 = vector.shape_cast %267 : vector<8x128xf32> to vector<1x8x128xf32>
    tpu.vector_store %arg13[%274, %c0_86, %c0_87], %277 {strides = array<i32>} : memref<8x8x128xf32, #tpu.memory_space<vmem>>, vector<1x8x128xf32>,
    %c7_i32 = arith.constant 7 : i32
    %278 = arith.index_cast %c7_i32 : i32 to index
    %c0_88 = arith.constant 0 : index
    %c0_89 = arith.constant 0 : index
    %279 = vector.load %arg1[%278, %c0_88, %c0_89] : memref<8x8x512xf32, #tpu.memory_space<vmem>>, vector<1x8x512xf32>
    %280 = vector.shape_cast %279 : vector<1x8x512xf32> to vector<8x512xf32>
    %c0_90 = arith.constant 0 : index
    %c0_91 = arith.constant 0 : index
    %281 = vector.load %arg4[%c0_90, %c0_91] : memref<128x512xf32, #tpu.memory_space<vmem>>, vector<128x512xf32>
    %cst_92 = arith.constant dense<0.000000e+00> : vector<8x512xf32>
    %282 = tpu.matmul %269, %281, %cst_92 {dimension_numbers = #tpu.dot_dimension_numbers<[1], [0], [0], [1], [0, 0, 1, 1], [], []>} : vector<8x128xf32>, vector<128x512xf32>, vector<8x512xf32> -> vector<8x512xf32>
    %283 = arith.addf %280, %282 : vector<8x512xf32>
    %284 = vector.extract_strided_slice %283 {offsets = [0, 0], sizes = [8, 128], strides = [1, 1]} : vector<8x512xf32> to vector<8x128xf32>
    %285 = arith.negf %284 : vector<8x128xf32>
    %286 = math.exp %285 : vector<8x128xf32>
    %cst_93 = arith.constant 1.000000e+00 : f32
    %287 = vector.broadcast %cst_93 : f32 to vector<8x128xf32>
    %288 = arith.addf %287, %286 : vector<8x128xf32>
    %289 = arith.divf %287, %288 : vector<8x128xf32>
    %290 = vector.extract_strided_slice %283 {offsets = [0, 128], sizes = [8, 128], strides = [1, 1]} : vector<8x512xf32> to vector<8x128xf32>
    %291 = arith.negf %290 : vector<8x128xf32>
    %292 = math.exp %291 : vector<8x128xf32>
    %cst_94 = arith.constant 1.000000e+00 : f32
    %293 = vector.broadcast %cst_94 : f32 to vector<8x128xf32>
    %294 = arith.addf %293, %292 : vector<8x128xf32>
    %295 = arith.divf %293, %294 : vector<8x128xf32>
    %296 = vector.extract_strided_slice %283 {offsets = [0, 256], sizes = [8, 128], strides = [1, 1]} : vector<8x512xf32> to vector<8x128xf32>
    %297 = math.tanh %296 : vector<8x128xf32>
    %298 = vector.extract_strided_slice %283 {offsets = [0, 384], sizes = [8, 128], strides = [1, 1]} : vector<8x512xf32> to vector<8x128xf32>
    %299 = arith.negf %298 : vector<8x128xf32>
    %300 = math.exp %299 : vector<8x128xf32>
    %cst_95 = arith.constant 1.000000e+00 : f32
    %301 = vector.broadcast %cst_95 : f32 to vector<8x128xf32>
    %302 = arith.addf %301, %300 : vector<8x128xf32>
    %303 = arith.divf %301, %302 : vector<8x128xf32>
    %304 = arith.mulf %295, %267 : vector<8x128xf32>
    %305 = arith.mulf %289, %297 : vector<8x128xf32>
    %306 = arith.addf %304, %305 : vector<8x128xf32>
    %307 = math.tanh %306 : vector<8x128xf32>
    %308 = arith.mulf %303, %307 : vector<8x128xf32>
    %309 = arith.index_cast %c7_i32 : i32 to index
    %c0_96 = arith.constant 0 : index
    %c0_97 = arith.constant 0 : index
    %310 = vector.load %arg12[%309, %c0_96, %c0_97] : memref<8x8x128xf32, #tpu.memory_space<vmem>>, vector<1x8x128xf32>
    %311 = vector.shape_cast %310 : vector<1x8x128xf32> to vector<8x128xf32>
    %312 = vector.shape_cast %308 : vector<8x128xf32> to vector<1x8x128xf32>
    tpu.vector_store %arg12[%309, %c0_96, %c0_97], %312 {strides = array<i32>} : memref<8x8x128xf32, #tpu.memory_space<vmem>>, vector<1x8x128xf32>,
    %313 = arith.index_cast %c7_i32 : i32 to index
    %c0_98 = arith.constant 0 : index
    %c0_99 = arith.constant 0 : index
    %314 = vector.load %arg13[%313, %c0_98, %c0_99] : memref<8x8x128xf32, #tpu.memory_space<vmem>>, vector<1x8x128xf32>
    %315 = vector.shape_cast %314 : vector<1x8x128xf32> to vector<8x128xf32>
    %316 = vector.shape_cast %306 : vector<8x128xf32> to vector<1x8x128xf32>
    tpu.vector_store %arg13[%313, %c0_98, %c0_99], %316 {strides = array<i32>} : memref<8x8x128xf32, #tpu.memory_space<vmem>>, vector<1x8x128xf32>,
    %c8_i32 = arith.constant 8 : i32
    %c0_100 = arith.constant 0 : index
    %c0_101 = arith.constant 0 : index
    %317 = vector.load %arg10[%c0_100, %c0_101] : memref<8x128xf32, #tpu.memory_space<vmem>>, vector<8x128xf32>
    tpu.vector_store %arg10[%c0_100, %c0_101], %308 {strides = array<i32>} : memref<8x128xf32, #tpu.memory_space<vmem>>, vector<8x128xf32>,
    %c0_102 = arith.constant 0 : index
    %c0_103 = arith.constant 0 : index
    %318 = vector.load %arg11[%c0_102, %c0_103] : memref<8x128xf32, #tpu.memory_space<vmem>>, vector<8x128xf32>
    tpu.vector_store %arg11[%c0_102, %c0_103], %306 {strides = array<i32>} : memref<8x128xf32, #tpu.memory_space<vmem>>, vector<8x128xf32>,
    %c0_i32_104 = arith.constant 0 : i32
    %319 = arith.cmpi eq, %arg0, %c0_i32_104 : i32
    %320 = arith.extui %319 : i1 to i32
    %c0_i32_105 = arith.constant 0 : i32
    %321 = arith.cmpi ne, %320, %c0_i32_105 : i32
    scf.if %321 {
      %c7 = arith.constant 7 : index
      %c0_117 = arith.constant 0 : index
      %c0_118 = arith.constant 0 : index
      %331 = vector.load %arg12[%c7, %c0_117, %c0_118] : memref<8x8x128xf32, #tpu.memory_space<vmem>>, vector<1x8x128xf32>
      %332 = vector.shape_cast %331 : vector<1x8x128xf32> to vector<8x128xf32>
      %c0_119 = arith.constant 0 : index
      %c0_120 = arith.constant 0 : index
      %333 = vector.load %arg8[%c0_119, %c0_120] : memref<8x128xf32, #tpu.memory_space<vmem>>, vector<8x128xf32>
      tpu.vector_store %arg8[%c0_119, %c0_120], %332 {strides = array<i32>} : memref<8x128xf32, #tpu.memory_space<vmem>>, vector<8x128xf32>,
      %c7_121 = arith.constant 7 : index
      %c0_122 = arith.constant 0 : index
      %c0_123 = arith.constant 0 : index
      %334 = vector.load %arg13[%c7_121, %c0_122, %c0_123] : memref<8x8x128xf32, #tpu.memory_space<vmem>>, vector<1x8x128xf32>
      %335 = vector.shape_cast %334 : vector<1x8x128xf32> to vector<8x128xf32>
      %c0_124 = arith.constant 0 : index
      %c0_125 = arith.constant 0 : index
      %336 = vector.load %arg9[%c0_124, %c0_125] : memref<8x128xf32, #tpu.memory_space<vmem>>, vector<8x128xf32>
      tpu.vector_store %arg9[%c0_124, %c0_125], %335 {strides = array<i32>} : memref<8x128xf32, #tpu.memory_space<vmem>>, vector<8x128xf32>,
    } else {
    }
    %c0_106 = arith.constant 0 : index
    %c0_107 = arith.constant 0 : index
    %c0_108 = arith.constant 0 : index
    %322 = vector.load %arg12[%c0_106, %c0_107, %c0_108] : memref<8x8x128xf32, #tpu.memory_space<vmem>>, vector<8x8x128xf32>
    %323 = vector.shape_cast %322 : vector<8x8x128xf32> to vector<64x128xf32>
    %c0_109 = arith.constant 0 : index
    %c0_110 = arith.constant 0 : index
    %324 = vector.load %arg5[%c0_109, %c0_110] : memref<128x128xf32, #tpu.memory_space<vmem>>, vector<128x128xf32>
    %cst_111 = arith.constant dense<0.000000e+00> : vector<64x128xf32>
    %325 = tpu.matmul %323, %324, %cst_111 {dimension_numbers = #tpu.dot_dimension_numbers<[1], [0], [0], [1], [0, 0, 1, 1], [], []>} : vector<64x128xf32>, vector<128x128xf32>, vector<64x128xf32> -> vector<64x128xf32>
    %c0_112 = arith.constant 0 : index
    %c0_113 = arith.constant 0 : index
    %326 = vector.load %arg6[%c0_112, %c0_113] : memref<1x128xf32, #tpu.memory_space<vmem>>, vector<1x128xf32>
    %327 = vector.broadcast %326 : vector<1x128xf32> to vector<64x128xf32>
    %328 = arith.addf %325, %327 : vector<64x128xf32>
    %329 = vector.shape_cast %328 : vector<64x128xf32> to vector<8x8x128xf32>
    %c0_114 = arith.constant 0 : index
    %c0_115 = arith.constant 0 : index
    %c0_116 = arith.constant 0 : index
    %330 = vector.load %arg7[%c0_114, %c0_115, %c0_116] : memref<8x8x128xf32, #tpu.memory_space<vmem>>, vector<8x8x128xf32>
    tpu.vector_store %arg7[%c0_114, %c0_115, %c0_116], %329 {strides = array<i32>} : memref<8x8x128xf32, #tpu.memory_space<vmem>>, vector<8x8x128xf32>,
    return
  }
  func.func @transform_0(%arg0: i32) -> (i32, i32, i32) {
    %c0_i32 = arith.constant 0 : i32
    %c0_i32_0 = arith.constant 0 : i32
    %c0_i32_1 = arith.constant 0 : i32
    return %arg0, %c0_i32, %c0_i32_0 : i32, i32, i32
  }
  func.func @transform_1(%arg0: i32) -> (i32, i32) {
    %c0_i32 = arith.constant 0 : i32
    %c0_i32_0 = arith.constant 0 : i32
    %c0_i32_1 = arith.constant 0 : i32
    return %c0_i32, %c0_i32_0 : i32, i32
  }
  func.func @transform_2(%arg0: i32) -> (i32, i32) {
    %c0_i32 = arith.constant 0 : i32
    %c0_i32_0 = arith.constant 0 : i32
    %c0_i32_1 = arith.constant 0 : i32
    return %c0_i32, %c0_i32_0 : i32, i32
  }
  func.func @transform_3(%arg0: i32) -> (i32, i32) {
    %c0_i32 = arith.constant 0 : i32
    %c0_i32_0 = arith.constant 0 : i32
    %c0_i32_1 = arith.constant 0 : i32
    return %c0_i32, %c0_i32_0 : i32, i32
  }
  func.func @transform_4(%arg0: i32) -> (i32, i32) {
    %c0_i32 = arith.constant 0 : i32
    %c0_i32_0 = arith.constant 0 : i32
    %c0_i32_1 = arith.constant 0 : i32
    return %c0_i32, %c0_i32_0 : i32, i32
  }
  func.func @transform_5(%arg0: i32) -> (i32, i32) {
    %c0_i32 = arith.constant 0 : i32
    %c0_i32_0 = arith.constant 0 : i32
    %c0_i32_1 = arith.constant 0 : i32
    return %c0_i32, %c0_i32_0 : i32, i32
  }
  func.func @transform_6(%arg0: i32) -> (i32, i32, i32) {
    %c0_i32 = arith.constant 0 : i32
    %c0_i32_0 = arith.constant 0 : i32
    %c0_i32_1 = arith.constant 0 : i32
    return %arg0, %c0_i32, %c0_i32_0 : i32, i32, i32
  }
  func.func @transform_7(%arg0: i32) -> (i32, i32) {
    %c0_i32 = arith.constant 0 : i32
    %c0_i32_0 = arith.constant 0 : i32
    %c0_i32_1 = arith.constant 0 : i32
    return %c0_i32, %c0_i32_0 : i32, i32
  }
  func.func @transform_8(%arg0: i32) -> (i32, i32) {
    %c0_i32 = arith.constant 0 : i32
    %c0_i32_0 = arith.constant 0 : i32
    %c0_i32_1 = arith.constant 0 : i32
    return %c0_i32, %c0_i32_0 : i32, i32
  }
}

</mosaic_0001>

<bundles_post_ra>
// kernel: tpu_custom_call.1
= control target key start
LH: loop header
LB: loop body
LE: loop exit
PB: predicated region body
PF: predicated region fallthrough
CT: control target
= control target key end

     0   :  { %14 = vsyncpa [#allocation7], 0  ;;  %s3828_s0 = inlined_call_operand.hbm [shape: f32[8,8,512], index: 0, kind: input, shape index: {}]   ;;  %s3829_s1 = inlined_call_operand.hbm [shape: f32[8,128], index: 1, kind: input, shape index: {}]   ;;  %s3830_s2 = inlined_call_operand.hbm [shape: f32[8,128], index: 2, kind: input, shape index: {}]   ;;  %s3831_s3 = inlined_call_operand.hbm [shape: f32[128,512], index: 3, kind: input, shape index: {}]   ;;  %s3832_s4 = inlined_call_operand.hbm [shape: f32[128,128], index: 4, kind: input, shape index: {}]   ;;  %s3833_s5 = inlined_call_operand.vmem [shape: f32[1,128], index: 5, kind: input, shape index: {}]   ;;  %s3834_s6 = inlined_call_operand.hbm [shape: f32[8,8,128], index: 6, kind: output, shape index: {0}]   ;;  %s3835_s7 = inlined_call_operand.hbm [shape: f32[8,128], index: 7, kind: output, shape index: {1}]   ;;  %s3836_s8 = inlined_call_operand.hbm [shape: f32[8,128], index: 8, kind: output, shape index: {2}]  }
   0x1   :  { %15 = vsyncpa [#allocation10], 0 }
   0x2   :  { %16 = vsyncpa [#allocation13], 0 }
   0x3   :  { %17 = vsyncpa [#allocation8], 0 }
   0x4   :  { %18 = vsyncpa [#allocation17], 0  ;;  %s3206_s27 = smov [#allocation9]   ;;  %s3020_s9 = scalar_lea.hbm %s3829_s1, 128 }
   0x5   :  { %s37_s28 = sshll.u32 %s3206_s27, 4  ;;  %p3021_p0 = scmp.ne.s32.totalorder %s3829_s1, %s3020_s9  ;;  %s38_s28 = int_to_ptr.vmem [resolvable:$true] %s37_s28 }
   0x6   :  { %p3024_p1 = scmp.lt.u32.totalorder %s3020_s9, %s3829_s1 }
   0x8   :  { %p3026_p2 = pnand %p3024_p1, %p3021_p0 }
   0xa   :  { %3029 = shalt.err (!%p3026_p2)
}
   0xb   :  { %s3030_s14 = scalar_lea.vmem %s38_s28, 128  ;;  %p3035_p4 = scmp.lt.s32.totalorder %s38_s28, %s38_s28 }
   0xc   :  { %p3031_p3 = scmp.ne.s32.totalorder %s38_s28, %s3030_s14  ;;  %p3036_p5 = scmp.lt.s32.totalorder %s3030_s14, %s3030_s14 }
   0xe   :  { %p3037_p6 = por %p3036_p5, %p3035_p4 }
  0x10   :  { %p3038_p7 = pnand %p3037_p6, %p3031_p3 }
  0x12   :  { %3041 = shalt.err (!%p3038_p7)
}
  0x13   :  { %40 = dma.hbm_to_vmem [thread:$0]  %s3829_s1, 128, %s38_s28, [#allocation10]  }
  0x14   :  { %s3207_s17 = smov [#allocation12]   ;;  %s3208_s19 = smov [#allocation6]  }
  0x15   :  { %s56_s18 = sshll.u32 %s3207_s17, 4  ;;  %s24_s20 = sshll.u32 %s3208_s19, 4  ;;  %s57_s18 = int_to_ptr.vmem [resolvable:$true] %s56_s18  ;;  %s25_s20 = int_to_ptr.vmem [resolvable:$true] %s24_s20 }
  0x16   :  { %s3042_s23 = scalar_lea.hbm %s3831_s3, 8192 }
  0x17   :  { %p3043_p8 = scmp.ne.s32.totalorder %s3831_s3, %s3042_s23  ;;  %p3046_p9 = scmp.lt.u32.totalorder %s3042_s23, %s3831_s3 }
  0x19   :  { %p3048_p10 = pnand %p3046_p9, %p3043_p8 }
  0x1b   :  { %3051 = shalt.err (!%p3048_p10)
}
  0x1c   :  { %s3052_s1 = scalar_lea.vmem %s57_s18, 8192  ;;  %p3057_p12 = scmp.lt.s32.totalorder %s57_s18, %s57_s18 }
  0x1d   :  { %p3053_p11 = scmp.ne.s32.totalorder %s57_s18, %s3052_s1  ;;  %p3058_p13 = scmp.lt.s32.totalorder %s3052_s1, %s3052_s1 }
  0x1f   :  { %p3059_p0 = por %p3058_p13, %p3057_p12 }
  0x21   :  { %p3060_p1 = pnand %p3059_p0, %p3053_p11 }
  0x23   :  { %3063 = shalt.err (!%p3060_p1)
}
  0x24   :  { %s3209_s28 = smov 512   ;;  %s3210_s29 = smov 32  }
  0x25   :  { %62 = dma.hbm_to_vmem [thread:$0]  %s3831_s3, 8192, %s57_s18, [#allocation13], %s3209_s28, %s3209_s28, %s3210_s29  }
  0x26   :  { %s3064_s12 = scalar_lea.hbm %s3828_s0, 4096 }
  0x27   :  { %p3065_p2 = scmp.ne.s32.totalorder %s3828_s0, %s3064_s12  ;;  %p3068_p3 = scmp.lt.u32.totalorder %s3064_s12, %s3828_s0 }
  0x29   :  { %p3070_p4 = pnand %p3068_p3, %p3065_p2 }
  0x2b   :  { %3073 = shalt.err (!%p3070_p4)
}
  0x2c   :  { %s3074_s17 = scalar_lea.vmem %s25_s20, 4096  ;;  %p3079_p6 = scmp.lt.s32.totalorder %s25_s20, %s25_s20 }
  0x2d   :  { %p3075_p5 = scmp.ne.s32.totalorder %s25_s20, %s3074_s17  ;;  %p3080_p7 = scmp.lt.s32.totalorder %s3074_s17, %s3074_s17 }
  0x2f   :  { %p3081_p8 = por %p3080_p7, %p3079_p6 }
  0x31   :  { %p3082_p9 = pnand %p3081_p8, %p3075_p5 }
  0x33   :  { %3085 = shalt.err (!%p3082_p9)
}
  0x34   :  { %30 = dma.hbm_to_vmem [thread:$0]  %s3828_s0, 4096, %s25_s20, [#allocation7], %s3209_s28, %s3209_s28, %s3210_s29  }
  0x35   :  { %s3211_s19 = smov [#allocation11]   ;;  %s3212_s22 = smov [#allocation14]  }
  0x36   :  { %s47_s21 = sshll.u32 %s3211_s19, 4  ;;  %s68_s23 = sshll.u32 %s3212_s22, 4  ;;  %s48_s21 = int_to_ptr.vmem [resolvable:$true] %s47_s21  ;;  %s69_s23 = int_to_ptr.vmem [resolvable:$true] %s68_s23 }
  0x37   :  { %s3086_s26 = scalar_lea.hbm %s3830_s2, 128 }
  0x38   :  { %p3087_p10 = scmp.ne.s32.totalorder %s3830_s2, %s3086_s26  ;;  %p3090_p11 = scmp.lt.u32.totalorder %s3086_s26, %s3830_s2 }
  0x3a   :  { %p3092_p12 = pnand %p3090_p11, %p3087_p10 }
  0x3c   :  { %3095 = shalt.err (!%p3092_p12)
}
  0x3d   :  { %s3096_s0 = scalar_lea.vmem %s48_s21, 128  ;;  %p3101_p0 = scmp.lt.s32.totalorder %s48_s21, %s48_s21 }
  0x3e   :  { %p3097_p13 = scmp.ne.s32.totalorder %s48_s21, %s3096_s0  ;;  %p3102_p1 = scmp.lt.s32.totalorder %s3096_s0, %s3096_s0 }
  0x40   :  { %p3103_p2 = por %p3102_p1, %p3101_p0 }
  0x42   :  { %p3104_p3 = pnand %p3103_p2, %p3097_p13 }
  0x44   :  { %3107 = shalt.err (!%p3104_p3)
}
  0x45   :  { %50 = dma.hbm_to_vmem [thread:$0]  %s3830_s2, 128, %s48_s21, [#allocation10]  }
  0x46   :  { %s3108_s11 = scalar_lea.hbm %s3832_s4, 2048 }
  0x47   :  { %p3109_p4 = scmp.ne.s32.totalorder %s3832_s4, %s3108_s11  ;;  %p3112_p5 = scmp.lt.u32.totalorder %s3108_s11, %s3832_s4 }
  0x49   :  { %p3114_p6 = pnand %p3112_p5, %p3109_p4 }
  0x4b   :  { %3117 = shalt.err (!%p3114_p6)
}
  0x4c   :  { %s3118_s16 = scalar_lea.vmem %s69_s23, 2048  ;;  %p3123_p8 = scmp.lt.s32.totalorder %s69_s23, %s69_s23 }
  0x4d   :  { %p3119_p7 = scmp.ne.s32.totalorder %s69_s23, %s3118_s16  ;;  %p3124_p9 = scmp.lt.s32.totalorder %s3118_s16, %s3118_s16 }
  0x4f   :  { %p3125_p10 = por %p3124_p9, %p3123_p8 }
  0x51   :  { %p3126_p11 = pnand %p3125_p10, %p3119_p7 }
  0x53   :  { %3129 = shalt.err (!%p3126_p11)
}
  0x54   :  { %s3213_s2 = smov 128   ;;  %s3214_s17 = smov 8  }
  0x55   :  { %74 = dma.hbm_to_vmem [thread:$0]  %s3832_s4, 2048, %s69_s23, [#allocation13], %s3213_s2, %s3213_s2, %s3214_s17  }
  0x56   :  { %3196 = dma.done.wait [#allocation7], 4096  }
  0x57   :  { %3197 = vsyncadd [#allocation7], 4294963200 }
  0x58   :  { %3198 = dma.done.wait [#allocation10], 256  }
  0x59   :  { %3199 = vsyncadd [#allocation10], 4294967040 }
  0x5a   :  { %3200 = dma.done.wait [#allocation13], 10240  }
  0x5b   :  { %3201 = vsyncadd [#allocation13], 4294957056  ;;  %v3215_v0 = vmov 0.0   ;;  %v107_v1 = vld [vmem:[#allocation12 + $0x8] sm:$0xff]  ;;  %v106_v3 = vld [vmem:[#allocation12] sm:$0xff] }
  0x5c   :  { %234 = vmatprep.mubr.f32.mxu1 %v3215_v0  ;;  %475 = vmatprep.mubr.f32.mxu0 %v3215_v0  ;;  %v111_v2 = vld [vmem:[#allocation12 + $0x28] sm:$0xff]  ;;  %v110_v5 = vld [vmem:[#allocation12 + $0x20] sm:$0xff]  ;;  %v109_v48 = vld [vmem:[#allocation12 + $0x18] sm:$0xff] }
  0x5d   :  { %v3329_v4 = vpack.c.bf16 %v111_v2, %v107_v1  ;;  %v115_v6 = vld [vmem:[#allocation12 + $0x48] sm:$0xff]  ;;  %v3331_v8 = vpack.c.bf16 %v110_v5, %v106_v3  ;;  %v114_v10 = vld [vmem:[#allocation12 + $0x40] sm:$0xff]  ;;  %v113_v49 = vld [vmem:[#allocation12 + $0x38] sm:$0xff] }
  0x5e   :  { %v119_v7 = vld [vmem:[#allocation12 + $0x68] sm:$0xff]  ;;  %v118_v11 = vld [vmem:[#allocation12 + $0x60] sm:$0xff]  ;;  %v3390_v51 = vpack.c.bf16 %v113_v49, %v109_v48  ;;  %v108_v52 = vld [vmem:[#allocation12 + $0x10] sm:$0xff] }
  0x5f   :  { %v3333_v9 = vpack.c.bf16 %v119_v7, %v115_v6  ;;  %v123_v12 = vld [vmem:[#allocation12 + $0x88] sm:$0xff]  ;;  %2336 = vmatprep.subr.bf16.mxu1 %v3329_v4  ;;  %2400 = vmatprep.subr.bf16.mxu0 %v3329_v4  ;;  %v3338_v14 = vpack.c.bf16 %v118_v11, %v114_v10  ;;  %v122_v16 = vld [vmem:[#allocation12 + $0x80] sm:$0xff]  ;;  %v112_v53 = vld [vmem:[#allocation12 + $0x30] sm:$0xff] }
  0x60   :  { %v127_v13 = vld [vmem:[#allocation12 + $0xa8] sm:$0xff]  ;;  %2338 = vmatpush1.bf16.msra.mxu1 %v3331_v8  ;;  %2402 = vmatpush1.bf16.msra.mxu0 %v3331_v8  ;;  %v126_v17 = vld [vmem:[#allocation12 + $0xa0] sm:$0xff]  ;;  %v117_v54 = vld [vmem:[#allocation12 + $0x58] sm:$0xff]  ;;  %v3394_v57 = vpack.c.bf16 %v112_v53, %v108_v52 }
  0x61   :  { %2340 = vmatprep.subr.bf16.mxu1 %v3333_v9  ;;  %v3342_v15 = vpack.c.bf16 %v127_v13, %v123_v12  ;;  %2404 = vmatprep.subr.bf16.mxu0 %v3333_v9  ;;  %v131_v18 = vld [vmem:[#allocation12 + $0xc8] sm:$0xff]  ;;  %v3346_v20 = vpack.c.bf16 %v126_v17, %v122_v16  ;;  %v130_v22 = vld [vmem:[#allocation12 + $0xc0] sm:$0xff]  ;;  %v121_v55 = vld [vmem:[#allocation12 + $0x78] sm:$0xff] }
  0x62   :  { %v135_v19 = vld [vmem:[#allocation12 + $0xe8] sm:$0xff]  ;;  %v134_v23 = vld [vmem:[#allocation12 + $0xe0] sm:$0xff]  ;;  %v96_v56 = vld [vmem:[#allocation9] sm:$0xff]  ;;  %v3398_v58 = vpack.c.bf16 %v121_v55, %v117_v54 }
  0x63   :  { %v3350_v21 = vpack.c.bf16 %v135_v19, %v131_v18  ;;  %v139_v24 = vld [vmem:[#allocation12 + $0x108] sm:$0xff]  ;;  %v3354_v26 = vpack.c.bf16 %v134_v23, %v130_v22  ;;  %v138_v28 = vld [vmem:[#allocation12 + $0x100] sm:$0xff]  ;;  %v116_v59 = vld [vmem:[#allocation12 + $0x50] sm:$0xff] }
  0x64   :  { %2342 = vmatpush1.bf16.msra.mxu1 %v3338_v14  ;;  %2406 = vmatpush1.bf16.msra.mxu0 %v3338_v14  ;;  %v143_v25 = vld [vmem:[#allocation12 + $0x128] sm:$0xff]  ;;  %v142_v29 = vld [vmem:[#allocation12 + $0x120] sm:$0xff]  ;;  %v120_v60 = vld [vmem:[#allocation12 + $0x70] sm:$0xff] }
  0x65   :  { %2344 = vmatprep.subr.bf16.mxu1 %v3342_v15  ;;  %2408 = vmatprep.subr.bf16.mxu0 %v3342_v15  ;;  %v3358_v27 = vpack.c.bf16 %v143_v25, %v139_v24  ;;  %v147_v30 = vld [vmem:[#allocation12 + $0x148] sm:$0xff]  ;;  %v3362_v32 = vpack.c.bf16 %v142_v29, %v138_v28  ;;  %v146_v34 = vld [vmem:[#allocation12 + $0x140] sm:$0xff]  ;;  %v125_v61 = vld [vmem:[#allocation12 + $0x98] sm:$0xff]  ;;  %v3402_v63 = vpack.c.bf16 %v120_v60, %v116_v59 }
  0x66   :  { %v151_v31 = vld [vmem:[#allocation12 + $0x168] sm:$0xff]  ;;  %v150_v35 = vld [vmem:[#allocation12 + $0x160] sm:$0xff]  ;;  %v129_v62 = vld [vmem:[#allocation12 + $0xb8] sm:$0xff] }
  0x67   :  { %v3366_v33 = vpack.c.bf16 %v151_v31, %v147_v30  ;;  %v155_v36 = vld [vmem:[#allocation12 + $0x188] sm:$0xff]  ;;  %v3370_v38 = vpack.c.bf16 %v150_v35, %v146_v34  ;;  %v154_v40 = vld [vmem:[#allocation12 + $0x180] sm:$0xff]  ;;  %v3406_v1 = vpack.c.bf16 %v129_v62, %v125_v61  ;;  %v124_v2 = vld [vmem:[#allocation12 + $0x90] sm:$0xff] }
  0x68   :  { %2346 = vmatpush1.bf16.msra.mxu1 %v3346_v20  ;;  %2410 = vmatpush1.bf16.msra.mxu0 %v3346_v20  ;;  %v159_v37 = vld [vmem:[#allocation12 + $0x1a8] sm:$0xff]  ;;  %v158_v41 = vld [vmem:[#allocation12 + $0x1a0] sm:$0xff]  ;;  %v128_v3 = vld [vmem:[#allocation12 + $0xb0] sm:$0xff] }
  0x69   :  { %2348 = vmatprep.subr.bf16.mxu1 %v3350_v21  ;;  %2412 = vmatprep.subr.bf16.mxu0 %v3350_v21  ;;  %v3374_v39 = vpack.c.bf16 %v159_v37, %v155_v36  ;;  %v163_v42 = vld [vmem:[#allocation12 + $0x1c8] sm:$0xff]  ;;  %v3378_v44 = vpack.c.bf16 %v158_v41, %v154_v40  ;;  %v162_v46 = vld [vmem:[#allocation12 + $0x1c0] sm:$0xff]  ;;  %v133_v5 = vld [vmem:[#allocation12 + $0xd8] sm:$0xff]  ;;  %v3409_v7 = vpack.c.bf16 %v128_v3, %v124_v2 }
  0x6a   :  { %v167_v43 = vld [vmem:[#allocation12 + $0x1e8] sm:$0xff]  ;;  %v166_v47 = vld [vmem:[#allocation12 + $0x1e0] sm:$0xff]  ;;  %v137_v6 = vld [vmem:[#allocation12 + $0xf8] sm:$0xff] }
  0x6b   :  { %v3382_v45 = vpack.c.bf16 %v167_v43, %v163_v42  ;;  %v3386_v50 = vpack.c.bf16 %v166_v47, %v162_v46  ;;  %v3412_v10 = vpack.c.bf16 %v137_v6, %v133_v5  ;;  %v132_v11 = vld [vmem:[#allocation12 + $0xd0] sm:$0xff]  ;;  %v141_v13 = vld [vmem:[#allocation12 + $0x118] sm:$0xff]  ;;  %v104_v6 = vld [vmem:[#allocation6 + $0x10] sm:$0xff] }
  0x6c   :  { %2350 = vmatpush1.bf16.msra.mxu1 %v3354_v26  ;;  %2414 = vmatpush1.bf16.msra.mxu0 %v3354_v26  ;;  %v136_v12 = vld [vmem:[#allocation12 + $0xf0] sm:$0xff]  ;;  %v145_v16 = vld [vmem:[#allocation12 + $0x138] sm:$0xff] }
  0x6d   :  { %2352 = vmatprep.subr.bf16.mxu1 %v3358_v27  ;;  %2416 = vmatprep.subr.bf16.mxu0 %v3358_v27  ;;  %v3415_v17 = vpack.c.bf16 %v136_v12, %v132_v11  ;;  %v3418_v18 = vpack.c.bf16 %v145_v16, %v141_v13  ;;  %v140_v19 = vld [vmem:[#allocation12 + $0x110] sm:$0xff]  ;;  %v149_v23 = vld [vmem:[#allocation12 + $0x158] sm:$0xff]  ;;  %v105_v11 = vld [vmem:[#allocation6 + $0x18] sm:$0xff] }
  0x6e   :  { %v144_v22 = vld [vmem:[#allocation12 + $0x130] sm:$0xff]  ;;  %v153_v24 = vld [vmem:[#allocation12 + $0x178] sm:$0xff] }
  0x6f   :  { %v3421_v25 = vpack.c.bf16 %v144_v22, %v140_v19  ;;  %v3424_v28 = vpack.c.bf16 %v153_v24, %v149_v23  ;;  %v148_v29 = vld [vmem:[#allocation12 + $0x150] sm:$0xff]  ;;  %v157_v31 = vld [vmem:[#allocation12 + $0x198] sm:$0xff] }
  0x70   :  { %2354 = vmatpush1.bf16.msra.mxu1 %v3362_v32  ;;  %2418 = vmatpush1.bf16.msra.mxu0 %v3362_v32  ;;  %v152_v30 = vld [vmem:[#allocation12 + $0x170] sm:$0xff]  ;;  %v161_v34 = vld [vmem:[#allocation12 + $0x1b8] sm:$0xff] }
  0x71   :  { %2356 = vmatprep.subr.bf16.mxu1 %v3366_v33  ;;  %2420 = vmatprep.subr.bf16.mxu0 %v3366_v33  ;;  %v3427_v35 = vpack.c.bf16 %v152_v30, %v148_v29  ;;  %v3430_v36 = vpack.c.bf16 %v161_v34, %v157_v31  ;;  %v156_v37 = vld [vmem:[#allocation12 + $0x190] sm:$0xff]  ;;  %v165_v41 = vld [vmem:[#allocation12 + $0x1d8] sm:$0xff] }
  0x72   :  { %v160_v40 = vld [vmem:[#allocation12 + $0x1b0] sm:$0xff]  ;;  %v169_v42 = vld [vmem:[#allocation12 + $0x1f8] sm:$0xff] }
  0x73   :  { %v3433_v43 = vpack.c.bf16 %v160_v40, %v156_v37  ;;  %v3436_v46 = vpack.c.bf16 %v169_v42, %v165_v41  ;;  %v164_v47 = vld [vmem:[#allocation12 + $0x1d0] sm:$0xff]  ;;  %v103_v54 = vld [vmem:[#allocation6 + $0x8] sm:$0xff] }
  0x74   :  { %2358 = vmatpush1.bf16.msra.mxu1 %v3370_v38  ;;  %2422 = vmatpush1.bf16.msra.mxu0 %v3370_v38  ;;  %v168_v48 = vld [vmem:[#allocation12 + $0x1f0] sm:$0xff]  ;;  %v98_v24 = vld [vmem:[#allocation11] sm:$0xff] }
  0x75   :  { %2360 = vmatprep.subr.bf16.mxu1 %v3374_v39  ;;  %2424 = vmatprep.subr.bf16.mxu0 %v3374_v39  ;;  %v3439_v49 = vpack.c.bf16 %v168_v48, %v164_v47  ;;  %v102_v55 = vld [vmem:[#allocation6] sm:$0xff] }
  0x78   :  { %2362 = vmatpush1.bf16.msra.mxu1 %v3378_v44  ;;  %2426 = vmatpush1.bf16.msra.mxu0 %v3378_v44 }
  0x79   :  { %2364 = vmatprep.subr.bf16.mxu1 %v3382_v45  ;;  %2428 = vmatprep.subr.bf16.mxu0 %v3382_v45 }
  0x7c   :  { %2366 = vmatpush1.bf16.msra.mxu1 %v3386_v50  ;;  %2430 = vmatpush1.bf16.msra.mxu0 %v3386_v50 }
  0x7d   :  { %2368 = vmatprep.subr.bf16.mxu1 %v3390_v51  ;;  %2464 = vmatprep.subr.bf16.mxu0 %v3329_v4 }
  0x7f   :  { %235 = vmatmul.mubr.f32.vlgmr.msra.gmra.mrb[0].mxu1 %v96_v56 }
  0x80   :  { %2370 = vmatpush1.bf16.msra.mxu1 %v3394_v57  ;;  %305 = vmatprep.mubr.f32.mxu1 %v3215_v0 }
  0x81   :  { %2372 = vmatprep.subr.bf16.mxu1 %v3398_v58 }
  0x84   :  { %2374 = vmatpush1.bf16.msra.mxu1 %v3402_v63 }
  0x85   :  { %2376 = vmatprep.subr.bf16.mxu1 %v3406_v1 }
  0x88   :  { %2378 = vmatpush1.bf16.msra.mxu1 %v3409_v7 }
  0x89   :  { %2380 = vmatprep.subr.bf16.mxu1 %v3412_v10 }
  0x8c   :  { %2382 = vmatpush1.bf16.msra.mxu1 %v3415_v17 }
  0x8d   :  { %2384 = vmatprep.subr.bf16.mxu1 %v3418_v18 }
  0x90   :  { %2386 = vmatpush1.bf16.msra.mxu1 %v3421_v25 }
  0x91   :  { %2388 = vmatprep.subr.bf16.mxu1 %v3424_v28 }
  0x94   :  { %2390 = vmatpush1.bf16.msra.mxu1 %v3427_v35 }
  0x95   :  { %2392 = vmatprep.subr.bf16.mxu1 %v3430_v36 }
  0x98   :  { %2394 = vmatpush1.bf16.msra.mxu1 %v3433_v43 }
  0x99   :  { %2396 = vmatprep.subr.bf16.mxu1 %v3436_v46 }
  0x9c   :  { %2398 = vmatpush1.bf16.msra.mxu1 %v3439_v49 }
  0x9d   :  { %2432 = vmatprep.subr.bf16.mxu1 %v3390_v51 }
  0x9f   :  { %306 = vmatmul.mubr.f32.vlgmr.msra.gmra.mrb[2].mxu1 %v96_v56 }
  0xa0   :  { %2434 = vmatpush1.bf16.msra.mxu1 %v3394_v57  ;;  %546 = vmatprep.mubr.f32.mxu1 %v3215_v0 }
  0xa1   :  { %2436 = vmatprep.subr.bf16.mxu1 %v3398_v58 }
  0xa4   :  { %2438 = vmatpush1.bf16.msra.mxu1 %v3402_v63 }
  0xa5   :  { %2440 = vmatprep.subr.bf16.mxu1 %v3406_v1 }
  0xa8   :  { %2442 = vmatpush1.bf16.msra.mxu1 %v3409_v7 }
  0xa9   :  { %2444 = vmatprep.subr.bf16.mxu1 %v3412_v10 }
  0xac   :  { %2446 = vmatpush1.bf16.msra.mxu1 %v3415_v17 }
  0xad   :  { %2448 = vmatprep.subr.bf16.mxu1 %v3418_v18 }
  0xb0   :  { %2450 = vmatpush1.bf16.msra.mxu1 %v3421_v25 }
  0xb1   :  { %2452 = vmatprep.subr.bf16.mxu1 %v3424_v28 }
  0xb4   :  { %2454 = vmatpush1.bf16.msra.mxu1 %v3427_v35 }
  0xb5   :  { %2456 = vmatprep.subr.bf16.mxu1 %v3430_v36 }
  0xb8   :  { %2458 = vmatpush1.bf16.msra.mxu1 %v3433_v43 }
  0xb9   :  { %2460 = vmatprep.subr.bf16.mxu1 %v3436_v46 }
  0xbc   :  { %2462 = vmatpush1.bf16.msra.mxu1 %v3439_v49 }
  0xbd   :  { %2496 = vmatprep.subr.bf16.mxu1 %v3390_v51 }
 0x152   :  { %v236_v52 = vpop.f32.mrb[0].mxu1 }
 0x153   :  { %v238_v53 = vpop.f32.mrb[1].mxu1  ;;  %v312_v59 = vadd.f32 %v236_v52, %v102_v55  ;;  %v345_v55 = vld [vmem:[#allocation6 + $0x30] sm:$0xff] }
 0x154   :  { %v313_v56 = vadd.f32 %v238_v53, %v103_v54  ;;  %v346_v54 = vld [vmem:[#allocation6 + $0x38] sm:$0xff] }
 0x155   :  { %v2242_v61 = vmul.f32 -1.442695, %v312_v59 }
 0x156   :  { %v2243_v60 = vmul.f32 -1.442695, %v313_v56 }
 0x158   :  { %2892 = vpow2.f32 %v2243_v60 }
 0x159   :  { %2894 = vpow2.f32 %v2242_v61 }
 0x162   :  { %v2893_v62 = vpop.eup %2892 }
 0x163   :  { %v2895_v2 = vpop.eup %2894  ;;  %v325_v3 = vadd.f32 1.0, %v2893_v62 }
 0x164   :  { %v319_v5 = vadd.f32 1.0, %v2895_v2 }
 0x165   :  { %2896 = vrcp.f32 %v325_v3 }
 0x166   :  { %2898 = vrcp.f32 %v319_v5 }
 0x16f   :  { %v2897_v23 = vpop.eup %2896 }
 0x170   :  { %v2899_v29 = vpop.eup %2898  ;;  %v335_v31 = vmul.f32 %v2897_v23, %v98_v24  ;;  %v894_v23 = vld [vmem:[#allocation12 + $0x1e8] sm:$0xff] }
 0x172   :  { %v307_v12 = vpop.f32.mrb[2].mxu1 }
 0x173   :  { %v314_v13 = vadd.f32 %v307_v12, %v104_v6  ;;  %v309_v16 = vpop.f32.mrb[3].mxu1 }
 0x174   :  { %v315_v19 = vadd.f32 %v309_v16, %v105_v11 }
 0x175   :  { %2900 = vtanh.f32 %v314_v13 }
 0x176   :  { %v2244_v22 = vmul.f32 -1.442695, %v315_v19 }
 0x178   :  { %2902 = vpow2.f32 %v2244_v22 }
 0x17f   :  { %v2901_v30 = vpop.eup %2900 }
 0x180   :  { %v336_v34 = vmul.f32 %v2901_v30, %v2899_v29  ;;  %v889_v30 = vld [vmem:[#allocation12 + $0x1c0] sm:$0xff] }
 0x182   :  { %v2903_v37 = vpop.eup %2902  ;;  %v3461_v40 = vadd.f32 %v336_v34, %v335_v31  ;;  %v893_v31 = vld [vmem:[#allocation12 + $0x1e0] sm:$0xff] }
 0x183   :  { %v332_v41 = vadd.f32 1.0, %v2903_v37  ;;  %v3556_v34 = vpack.c.bf16 %v893_v31, %v889_v30  ;;  %v586_v37 = vld [vmem:[#allocation6 + $0x40] sm:$0xff] }
 0x184   :  { %2904 = vtanh.f32 %v3461_v40  ;;  %v1086_v31 = vld [vmem:[#allocation12 + $0x50] sm:$0xff] }
 0x185   :  { %2906 = vrcp.f32 %v332_v41 }
 0x18e   :  { %v2905_v42 = vpop.eup %2904 }
 0x18f   :  { %v2907_v47 = vpop.eup %2906 }
 0x190   :  { %v3464_v48 = vmul.f32 %v2907_v47, %v2905_v42 }
 0x192   :  { %476 = vmatmul.mubr.f32.vlgmr.msra.gmra.mrb[0].mxu0 %v3464_v48  ;;  %547 = vmatmul.mubr.f32.vlgmr.msra.gmra.mrb[4].mxu1 %v3464_v48 }
 0x193   :  { %2466 = vmatpush1.bf16.msra.mxu0 %v3331_v8  ;;  %2498 = vmatpush1.bf16.msra.mxu1 %v3394_v57 }
 0x194   :  { %2468 = vmatprep.subr.bf16.mxu0 %v3333_v9  ;;  %2500 = vmatprep.subr.bf16.mxu1 %v3398_v58 }
 0x195   :  { %718 = vmatprep.mubr.f32.mxu0 %v3215_v0  ;;  %789 = vmatprep.mubr.f32.mxu1 %v3215_v0 }
 0x197   :  { %2470 = vmatpush1.bf16.msra.mxu0 %v3338_v14  ;;  %2502 = vmatpush1.bf16.msra.mxu1 %v3402_v63 }
 0x198   :  { %2472 = vmatprep.subr.bf16.mxu0 %v3342_v15  ;;  %2504 = vmatprep.subr.bf16.mxu1 %v3406_v1 }
 0x19b   :  { %2474 = vmatpush1.bf16.msra.mxu0 %v3346_v20  ;;  %2506 = vmatpush1.bf16.msra.mxu1 %v3409_v7 }
 0x19c   :  { %2476 = vmatprep.subr.bf16.mxu0 %v3350_v21  ;;  %2508 = vmatprep.subr.bf16.mxu1 %v3412_v10 }
 0x19f   :  { %2478 = vmatpush1.bf16.msra.mxu0 %v3354_v26  ;;  %2510 = vmatpush1.bf16.msra.mxu1 %v3415_v17  ;;  %v343_v26 = vld [vmem:[#allocation6 + $0x20] sm:$0xff] }
 0x1a0   :  { %2480 = vmatprep.subr.bf16.mxu0 %v3358_v27  ;;  %2512 = vmatprep.subr.bf16.mxu1 %v3418_v18  ;;  %v344_v27 = vld [vmem:[#allocation6 + $0x28] sm:$0xff] }
 0x1a3   :  { %2482 = vmatpush1.bf16.msra.mxu0 %v3362_v32  ;;  %2514 = vmatpush1.bf16.msra.mxu1 %v3421_v25 }
 0x1a4   :  { %2484 = vmatprep.subr.bf16.mxu0 %v3366_v33  ;;  %2516 = vmatprep.subr.bf16.mxu1 %v3424_v28 }
 0x1a7   :  { %2486 = vmatpush1.bf16.msra.mxu0 %v3370_v38  ;;  %2518 = vmatpush1.bf16.msra.mxu1 %v3427_v35 }
 0x1a8   :  { %2488 = vmatprep.subr.bf16.mxu0 %v3374_v39  ;;  %2520 = vmatprep.subr.bf16.mxu1 %v3430_v36 }
 0x1ab   :  { %2490 = vmatpush1.bf16.msra.mxu0 %v3378_v44  ;;  %2522 = vmatpush1.bf16.msra.mxu1 %v3433_v43 }
 0x1ac   :  { %2492 = vmatprep.subr.bf16.mxu0 %v3382_v45  ;;  %2524 = vmatprep.subr.bf16.mxu1 %v3436_v46 }
 0x1af   :  { %2494 = vmatpush1.bf16.msra.mxu0 %v3386_v50  ;;  %2526 = vmatpush1.bf16.msra.mxu1 %v3439_v49 }
 0x1b0   :  { %2528 = vmatprep.subr.bf16.mxu0 %v3329_v4  ;;  %2560 = vmatprep.subr.bf16.mxu1 %v3390_v51 }
 0x265   :  { %v477_v32 = vpop.f32.mrb[0].mxu0  ;;  %v548_v33 = vpop.f32.mrb[4].mxu1 }
 0x266   :  { %v553_v38 = vadd.f32 %v477_v32, %v343_v26  ;;  %v479_v39 = vpop.f32.mrb[1].mxu0  ;;  %v550_v44 = vpop.f32.mrb[5].mxu1  ;;  %v555_v59 = vadd.f32 %v548_v33, %v345_v55 }
 0x267   :  { %v554_v52 = vadd.f32 %v479_v39, %v344_v27  ;;  %v556_v50 = vadd.f32 %v550_v44, %v346_v54  ;;  %v589_v39 = vld [vmem:[#allocation6 + $0x58] sm:$0xff] }
 0x268   :  { %v2245_v53 = vmul.f32 -1.442695, %v553_v38 }
 0x269   :  { %v2246_v45 = vmul.f32 -1.442695, %v554_v52  ;;  %v2247_v56 = vmul.f32 -1.442695, %v556_v50  ;;  %v588_v52 = vld [vmem:[#allocation6 + $0x50] sm:$0xff] }
 0x26a   :  { %2908 = vpow2.f32 %v2245_v53 }
 0x26b   :  { %2910 = vpow2.f32 %v2246_v45 }
 0x26c   :  { %2912 = vpow2.f32 %v2247_v56 }
 0x26d   :  { %2914 = vtanh.f32 %v555_v59 }
 0x274   :  { %v2909_v4 = vpop.eup %2908 }
 0x275   :  { %v2911_v60 = vpop.eup %2910  ;;  %v560_v51 = vadd.f32 1.0, %v2909_v4 }
 0x276   :  { %v566_v61 = vadd.f32 1.0, %v2911_v60  ;;  %v2913_v62 = vpop.eup %2912 }
 0x277   :  { %2916 = vrcp.f32 %v560_v51  ;;  %v2915_v2 = vpop.eup %2914  ;;  %v573_v11 = vadd.f32 1.0, %v2913_v62 }
 0x278   :  { %2918 = vrcp.f32 %v566_v61 }
 0x279   :  { %2920 = vrcp.f32 %v573_v11 }
 0x281   :  { %v2917_v3 = vpop.eup %2916 }
 0x282   :  { %v2919_v5 = vpop.eup %2918  ;;  %v577_v6 = vmul.f32 %v2917_v3, %v2915_v2 }
 0x283   :  { %v576_v12 = vmul.f32 %v2919_v5, %v3461_v40  ;;  %v2921_v16 = vpop.eup %2920  ;;  %v587_v40 = vld [vmem:[#allocation6 + $0x48] sm:$0xff] }
 0x285   :  { %v3503_v13 = vadd.f32 %v577_v6, %v576_v12  ;;  %v1077_v12 = vld [vmem:[#allocation12 + $0x8] sm:$0xff] }
 0x287   :  { %2922 = vtanh.f32 %v3503_v13 }
 0x291   :  { %v2923_v19 = vpop.eup %2922 }
 0x292   :  { %v3506_v22 = vmul.f32 %v2923_v19, %v2921_v16  ;;  %v1081_v16 = vld [vmem:[#allocation12 + $0x28] sm:$0xff] }
 0x293   :  { %v3570_v19 = vpack.c.bf16 %v1081_v16, %v1077_v12  ;;  %v1119_v16 = vld [vmem:[#allocation12 + $0x158] sm:$0xff] }
 0x294   :  { %719 = vmatmul.mubr.f32.vlgmr.msra.gmra.mrb[2].mxu0 %v3506_v22  ;;  %790 = vmatmul.mubr.f32.vlgmr.msra.gmra.mrb[6].mxu1 %v3506_v22 }
 0x295   :  { %2530 = vmatpush1.bf16.msra.mxu0 %v3331_v8  ;;  %2562 = vmatpush1.bf16.msra.mxu1 %v3394_v57  ;;  %v857_v8 = vld [vmem:[#allocation12 + $0xc0] sm:$0xff] }
 0x296   :  { %2532 = vmatprep.subr.bf16.mxu0 %v3333_v9  ;;  %2564 = vmatprep.subr.bf16.mxu1 %v3398_v58  ;;  %v861_v9 = vld [vmem:[#allocation12 + $0xe0] sm:$0xff] }
 0x297   :  { %961 = vmatprep.mubr.f32.mxu0 %v3215_v0  ;;  %1032 = vmatprep.mubr.f32.mxu1 %v3215_v0  ;;  %v865_v57 = vld [vmem:[#allocation12 + $0x100] sm:$0xff] }
 0x298   :  { %v869_v58 = vld [vmem:[#allocation12 + $0x120] sm:$0xff] }
 0x299   :  { %2534 = vmatpush1.bf16.msra.mxu0 %v3338_v14  ;;  %2566 = vmatpush1.bf16.msra.mxu1 %v3402_v63  ;;  %v3533_v14 = vpack.c.bf16 %v861_v9, %v857_v8  ;;  %v3538_v63 = vpack.c.bf16 %v869_v58, %v865_v57  ;;  %v1083_v8 = vld [vmem:[#allocation12 + $0x38] sm:$0xff]  ;;  %v1076_v9 = vld [vmem:[#allocation12] sm:$0xff]  ;;  %v1078_v58 = vld [vmem:[#allocation12 + $0x10] sm:$0xff] }
 0x29a   :  { %2536 = vmatprep.subr.bf16.mxu0 %v3342_v15  ;;  %2568 = vmatprep.subr.bf16.mxu1 %v3406_v1  ;;  %v866_v15 = vld [vmem:[#allocation12 + $0x108] sm:$0xff] }
 0x29b   :  { %v874_v1 = vld [vmem:[#allocation12 + $0x148] sm:$0xff] }
 0x29d   :  { %2538 = vmatpush1.bf16.msra.mxu0 %v3346_v20  ;;  %2570 = vmatpush1.bf16.msra.mxu1 %v3409_v7  ;;  %v870_v20 = vld [vmem:[#allocation12 + $0x128] sm:$0xff] }
 0x29e   :  { %2540 = vmatprep.subr.bf16.mxu0 %v3350_v21  ;;  %2572 = vmatprep.subr.bf16.mxu1 %v3412_v10  ;;  %v3536_v21 = vpack.c.bf16 %v870_v20, %v866_v15  ;;  %v878_v7 = vld [vmem:[#allocation12 + $0x168] sm:$0xff]  ;;  %v873_v10 = vld [vmem:[#allocation12 + $0x140] sm:$0xff] }
 0x29f   :  { %v1080_v15 = vld [vmem:[#allocation12 + $0x20] sm:$0xff] }
 0x2a0   :  { %v3574_v57 = vpack.c.bf16 %v1080_v15, %v1076_v9  ;;  %v1122_v15 = vld [vmem:[#allocation12 + $0x170] sm:$0xff] }
 0x2a1   :  { %2574 = vmatpush1.bf16.msra.mxu1 %v3415_v17  ;;  %2542 = vmatpush1.bf16.msra.mxu0 %v3533_v14  ;;  %v3542_v17 = vpack.c.bf16 %v878_v7, %v874_v1  ;;  %v1082_v1 = vld [vmem:[#allocation12 + $0x30] sm:$0xff] }
 0x2a2   :  { %2576 = vmatprep.subr.bf16.mxu1 %v3418_v18  ;;  %2544 = vmatprep.subr.bf16.mxu0 %v3536_v21  ;;  %v877_v18 = vld [vmem:[#allocation12 + $0x160] sm:$0xff]  ;;  %v3577_v7 = vpack.c.bf16 %v1082_v1, %v1078_v58  ;;  %v1127_v58 = vld [vmem:[#allocation12 + $0x198] sm:$0xff] }
 0x2a3   :  { %v1131_v1 = vld [vmem:[#allocation12 + $0x1b8] sm:$0xff] }
 0x2a5   :  { %2578 = vmatpush1.bf16.msra.mxu1 %v3421_v25  ;;  %2546 = vmatpush1.bf16.msra.mxu0 %v3538_v63  ;;  %v882_v25 = vld [vmem:[#allocation12 + $0x188] sm:$0xff] }
 0x2a6   :  { %2580 = vmatprep.subr.bf16.mxu1 %v3424_v28  ;;  %v886_v28 = vld [vmem:[#allocation12 + $0x1a8] sm:$0xff]  ;;  %2548 = vmatprep.subr.bf16.mxu0 %v3542_v17 }
 0x2a9   :  { %2582 = vmatpush1.bf16.msra.mxu1 %v3427_v35  ;;  %v3544_v35 = vpack.c.bf16 %v877_v18, %v873_v10  ;;  %v1085_v10 = vld [vmem:[#allocation12 + $0x48] sm:$0xff] }
 0x2aa   :  { %2584 = vmatprep.subr.bf16.mxu1 %v3430_v36  ;;  %v3546_v36 = vpack.c.bf16 %v886_v28, %v882_v25  ;;  %v1089_v18 = vld [vmem:[#allocation12 + $0x68] sm:$0xff]  ;;  %v1087_v25 = vld [vmem:[#allocation12 + $0x58] sm:$0xff] }
 0x2ab   :  { %2550 = vmatpush1.bf16.msra.mxu0 %v3544_v35  ;;  %v3582_v28 = vpack.c.bf16 %v1089_v18, %v1085_v10  ;;  %v3630_v18 = vpack.c.bf16 %v1131_v1, %v1127_v58 }
 0x2ac   :  { %2552 = vmatprep.subr.bf16.mxu0 %v3546_v36 }
 0x2ad   :  { %2586 = vmatpush1.bf16.msra.mxu1 %v3433_v43  ;;  %v881_v43 = vld [vmem:[#allocation12 + $0x180] sm:$0xff] }
 0x2ae   :  { %2588 = vmatprep.subr.bf16.mxu1 %v3436_v46  ;;  %v885_v46 = vld [vmem:[#allocation12 + $0x1a0] sm:$0xff] }
 0x2af   :  { %v3550_v24 = vpack.c.bf16 %v885_v46, %v881_v43  ;;  %v1091_v43 = vld [vmem:[#allocation12 + $0x78] sm:$0xff]  ;;  %v1084_v46 = vld [vmem:[#allocation12 + $0x40] sm:$0xff] }
 0x2b1   :  { %2590 = vmatpush1.bf16.msra.mxu1 %v3439_v49  ;;  %v890_v49 = vld [vmem:[#allocation12 + $0x1c8] sm:$0xff]  ;;  %2554 = vmatpush1.bf16.msra.mxu0 %v3550_v24 }
 0x2b2   :  { %v3553_v29 = vpack.c.bf16 %v894_v23, %v890_v49  ;;  %v1088_v49 = vld [vmem:[#allocation12 + $0x60] sm:$0xff]  ;;  %v3584_v23 = vpack.c.bf16 %v1091_v43, %v1087_v25  ;;  %v1126_v25 = vld [vmem:[#allocation12 + $0x190] sm:$0xff] }
 0x2b3   :  { %v3586_v30 = vpack.c.bf16 %v1088_v49, %v1084_v46  ;;  %v1130_v43 = vld [vmem:[#allocation12 + $0x1b0] sm:$0xff]  ;;  %v1135_v46 = vld [vmem:[#allocation12 + $0x1d8] sm:$0xff] }
 0x2b4   :  { %2556 = vmatprep.subr.bf16.mxu0 %v3553_v29  ;;  %v1139_v49 = vld [vmem:[#allocation12 + $0x1f8] sm:$0xff] }
 0x2b5   :  { %2558 = vmatpush1.bf16.msra.mxu0 %v3556_v34 }
 0x2b6   :  { %2592 = vmatprep.subr.bf16.mxu0 %v3570_v19 }
 0x367   :  { %v720_v41 = vpop.f32.mrb[2].mxu0  ;;  %v791_v42 = vpop.f32.mrb[6].mxu1 }
 0x368   :  { %v796_v47 = vadd.f32 %v720_v41, %v586_v37  ;;  %v722_v26 = vpop.f32.mrb[3].mxu0  ;;  %v793_v27 = vpop.f32.mrb[7].mxu1  ;;  %v798_v45 = vadd.f32 %v791_v42, %v588_v52  ;;  %v1090_v37 = vld [vmem:[#allocation12 + $0x70] sm:$0xff]  ;;  %v1093_v41 = vld [vmem:[#allocation12 + $0x88] sm:$0xff] }
 0x369   :  { %v797_v32 = vadd.f32 %v722_v26, %v587_v40  ;;  %v799_v44 = vadd.f32 %v793_v27, %v589_v39  ;;  %v3589_v40 = vpack.c.bf16 %v1090_v37, %v1086_v31  ;;  %v1097_v42 = vld [vmem:[#allocation12 + $0xa8] sm:$0xff]  ;;  %v1099_v27 = vld [vmem:[#allocation12 + $0xb8] sm:$0xff]  ;;  %v1098_v52 = vld [vmem:[#allocation12 + $0xb0] sm:$0xff]  ;;  %v3635_v31 = vpack.c.bf16 %v1130_v43, %v1126_v25 }
 0x36a   :  { %v2248_v33 = vmul.f32 -1.442695, %v796_v47  ;;  %v1095_v47 = vld [vmem:[#allocation12 + $0x98] sm:$0xff]  ;;  %v3594_v26 = vpack.c.bf16 %v1097_v42, %v1093_v41  ;;  %v3638_v37 = vpack.c.bf16 %v1139_v49, %v1135_v46  ;;  %v1134_v41 = vld [vmem:[#allocation12 + $0x1d0] sm:$0xff] }
 0x36b   :  { %v2249_v38 = vmul.f32 -1.442695, %v797_v32  ;;  %v2250_v53 = vmul.f32 -1.442695, %v799_v44  ;;  %v1092_v32 = vld [vmem:[#allocation12 + $0x80] sm:$0xff]  ;;  %v1094_v44 = vld [vmem:[#allocation12 + $0x90] sm:$0xff] }
 0x36c   :  { %2924 = vpow2.f32 %v2248_v33  ;;  %v1096_v33 = vld [vmem:[#allocation12 + $0xa0] sm:$0xff]  ;;  %v1138_v42 = vld [vmem:[#allocation12 + $0x1f0] sm:$0xff] }
 0x36d   :  { %2926 = vpow2.f32 %v2249_v38  ;;  %v3596_v38 = vpack.c.bf16 %v1099_v27, %v1095_v47  ;;  %v3598_v39 = vpack.c.bf16 %v1096_v33, %v1092_v32  ;;  %v3643_v47 = vpack.c.bf16 %v1138_v42, %v1134_v41  ;;  %v829_v27 = vld [vmem:[#allocation6 + $0x60] sm:$0xff]  ;;  %v830_v32 = vld [vmem:[#allocation6 + $0x68] sm:$0xff] }
 0x36e   :  { %2928 = vpow2.f32 %v2250_v53  ;;  %v3601_v53 = vpack.c.bf16 %v1098_v52, %v1094_v44 }
 0x36f   :  { %2930 = vtanh.f32 %v798_v45  ;;  %v1101_v45 = vld [vmem:[#allocation12 + $0xc8] sm:$0xff] }
 0x376   :  { %v2925_v54 = vpop.eup %2924 }
 0x377   :  { %v2927_v50 = vpop.eup %2926  ;;  %v803_v55 = vadd.f32 1.0, %v2925_v54  ;;  %v1105_v54 = vld [vmem:[#allocation12 + $0xe8] sm:$0xff] }
 0x378   :  { %v809_v56 = vadd.f32 1.0, %v2927_v50  ;;  %v2929_v59 = vpop.eup %2928  ;;  %v1103_v50 = vld [vmem:[#allocation12 + $0xd8] sm:$0xff] }
 0x379   :  { %2932 = vrcp.f32 %v803_v55  ;;  %v2931_v4 = vpop.eup %2930  ;;  %v816_v62 = vadd.f32 1.0, %v2929_v59  ;;  %v3606_v55 = vpack.c.bf16 %v1105_v54, %v1101_v45  ;;  %v1102_v59 = vld [vmem:[#allocation12 + $0xd0] sm:$0xff] }
 0x37a   :  { %2934 = vrcp.f32 %v809_v56  ;;  %v1107_v56 = vld [vmem:[#allocation12 + $0xf8] sm:$0xff] }
 0x37b   :  { %2936 = vrcp.f32 %v816_v62  ;;  %v1115_v62 = vld [vmem:[#allocation12 + $0x138] sm:$0xff] }
 0x383   :  { %v2933_v60 = vpop.eup %2932 }
 0x384   :  { %v2935_v51 = vpop.eup %2934  ;;  %v820_v61 = vmul.f32 %v2933_v60, %v2931_v4  ;;  %v1106_v4 = vld [vmem:[#allocation12 + $0xf0] sm:$0xff]  ;;  %v3608_v60 = vpack.c.bf16 %v1107_v56, %v1103_v50 }
 0x385   :  { %v819_v2 = vmul.f32 %v2935_v51, %v3503_v13  ;;  %v2937_v5 = vpop.eup %2936  ;;  %v1079_v13 = vld [vmem:[#allocation12 + $0x18] sm:$0xff]  ;;  %v3610_v51 = vpack.c.bf16 %v1106_v4, %v1102_v59  ;;  %v832_v4 = vld [vmem:[#allocation6 + $0x78] sm:$0xff] }
 0x386   :  { %v3572_v20 = vpack.c.bf16 %v1083_v8, %v1079_v13  ;;  %v1123_v13 = vld [vmem:[#allocation12 + $0x178] sm:$0xff]  ;;  %v1118_v8 = vld [vmem:[#allocation12 + $0x150] sm:$0xff] }
 0x387   :  { %v3561_v3 = vadd.f32 %v820_v61, %v819_v2  ;;  %v1111_v61 = vld [vmem:[#allocation12 + $0x118] sm:$0xff]  ;;  %v3623_v9 = vpack.c.bf16 %v1123_v13, %v1119_v16  ;;  %v3627_v10 = vpack.c.bf16 %v1122_v15, %v1118_v8 }
 0x388   :  { %2624 = vmatprep.subr.bf16.mxu1 %v3572_v20  ;;  %v3617_v2 = vpack.c.bf16 %v1115_v62, %v1111_v61  ;;  %v831_v62 = vld [vmem:[#allocation6 + $0x70] sm:$0xff] }
 0x389   :  { %2938 = vtanh.f32 %v3561_v3 }
 0x393   :  { %v2939_v6 = vpop.eup %2938 }
 0x394   :  { %v3564_v11 = vmul.f32 %v2939_v6, %v2937_v5  ;;  %v1110_v5 = vld [vmem:[#allocation12 + $0x110] sm:$0xff] }
 0x395   :  { %v1114_v6 = vld [vmem:[#allocation12 + $0x130] sm:$0xff] }
 0x396   :  { %962 = vmatmul.mubr.f32.vlgmr.msra.gmra.mrb[4].mxu0 %v3564_v11  ;;  %1033 = vmatmul.mubr.f32.vlgmr.msra.gmra.mrb[8].mxu1 %v3564_v11  ;;  %v3619_v12 = vpack.c.bf16 %v1114_v6, %v1110_v5 }
 0x397   :  { %1204 = vmatprep.mubr.f32.mxu0 %v3215_v0  ;;  %1275 = vmatprep.mubr.f32.mxu1 %v3215_v0 }
 0x398   :  { %2594 = vmatpush1.bf16.msra.mxu0 %v3574_v57  ;;  %2626 = vmatpush1.bf16.msra.mxu1 %v3577_v7 }
 0x399   :  { %2596 = vmatprep.subr.bf16.mxu0 %v3582_v28  ;;  %2628 = vmatprep.subr.bf16.mxu1 %v3584_v23 }
 0x39c   :  { %2598 = vmatpush1.bf16.msra.mxu0 %v3586_v30  ;;  %2630 = vmatpush1.bf16.msra.mxu1 %v3589_v40 }
 0x39d   :  { %2600 = vmatprep.subr.bf16.mxu0 %v3594_v26  ;;  %2632 = vmatprep.subr.bf16.mxu1 %v3596_v38 }
 0x3a0   :  { %2602 = vmatpush1.bf16.msra.mxu0 %v3598_v39  ;;  %2634 = vmatpush1.bf16.msra.mxu1 %v3601_v53 }
 0x3a1   :  { %2604 = vmatprep.subr.bf16.mxu0 %v3606_v55  ;;  %2636 = vmatprep.subr.bf16.mxu1 %v3608_v60 }
 0x3a4   :  { %2606 = vmatpush1.bf16.msra.mxu0 %v3533_v14  ;;  %2638 = vmatpush1.bf16.msra.mxu1 %v3610_v51 }
 0x3a5   :  { %2608 = vmatprep.subr.bf16.mxu0 %v3536_v21  ;;  %2640 = vmatprep.subr.bf16.mxu1 %v3617_v2 }
 0x3a8   :  { %2610 = vmatpush1.bf16.msra.mxu0 %v3538_v63  ;;  %2642 = vmatpush1.bf16.msra.mxu1 %v3619_v12 }
 0x3a9   :  { %2612 = vmatprep.subr.bf16.mxu0 %v3542_v17  ;;  %2644 = vmatprep.subr.bf16.mxu1 %v3623_v9 }
 0x3ac   :  { %2614 = vmatpush1.bf16.msra.mxu0 %v3544_v35  ;;  %2646 = vmatpush1.bf16.msra.mxu1 %v3627_v10 }
 0x3ad   :  { %2616 = vmatprep.subr.bf16.mxu0 %v3546_v36  ;;  %2648 = vmatprep.subr.bf16.mxu1 %v3630_v18 }
 0x3b0   :  { %2618 = vmatpush1.bf16.msra.mxu0 %v3550_v24  ;;  %2650 = vmatpush1.bf16.msra.mxu1 %v3635_v31 }
 0x3b1   :  { %2620 = vmatprep.subr.bf16.mxu0 %v3553_v29  ;;  %2652 = vmatprep.subr.bf16.mxu1 %v3638_v37 }
 0x3b4   :  { %2622 = vmatpush1.bf16.msra.mxu0 %v3556_v34  ;;  %2654 = vmatpush1.bf16.msra.mxu1 %v3643_v47 }
 0x3b5   :  { %2656 = vmatprep.subr.bf16.mxu0 %v3570_v19  ;;  %2688 = vmatprep.subr.bf16.mxu1 %v3572_v20 }
 0x469   :  { %v963_v33 = vpop.f32.mrb[4].mxu0  ;;  %v1034_v44 = vpop.f32.mrb[8].mxu1 }
 0x46a   :  { %v1039_v52 = vadd.f32 %v963_v33, %v829_v27  ;;  %v965_v45 = vpop.f32.mrb[5].mxu0  ;;  %v1036_v54 = vpop.f32.mrb[9].mxu1  ;;  %v1041_v6 = vadd.f32 %v1034_v44, %v831_v62  ;;  %v1073_v44 = vld [vmem:[#allocation6 + $0x88] sm:$0xff]  ;;  %v1075_v62 = vld [vmem:[#allocation6 + $0x98] sm:$0xff] }
 0x46b   :  { %v1040_v50 = vadd.f32 %v965_v45, %v830_v32  ;;  %v1042_v61 = vadd.f32 %v1036_v54, %v832_v4 }
 0x46c   :  { %v2251_v56 = vmul.f32 -1.442695, %v1039_v52 }
 0x46d   :  { %v2252_v59 = vmul.f32 -1.442695, %v1040_v50  ;;  %v2253_v5 = vmul.f32 -1.442695, %v1042_v61 }
 0x46e   :  { %2940 = vpow2.f32 %v2251_v56 }
 0x46f   :  { %2942 = vpow2.f32 %v2252_v59 }
 0x470   :  { %2944 = vpow2.f32 %v2253_v5 }
 0x471   :  { %2946 = vtanh.f32 %v1041_v6  ;;  %v1074_v6 = vld [vmem:[#allocation6 + $0x90] sm:$0xff] }
 0x478   :  { %v2941_v16 = vpop.eup %2940 }
 0x479   :  { %v2943_v13 = vpop.eup %2942  ;;  %v1046_v8 = vadd.f32 1.0, %v2941_v16 }
 0x47a   :  { %v1052_v15 = vadd.f32 1.0, %v2943_v13  ;;  %v2945_v58 = vpop.eup %2944 }
 0x47b   :  { %2948 = vrcp.f32 %v1046_v8  ;;  %v2947_v1 = vpop.eup %2946  ;;  %v1059_v49 = vadd.f32 1.0, %v2945_v58 }
 0x47c   :  { %2950 = vrcp.f32 %v1052_v15 }
 0x47d   :  { %2952 = vrcp.f32 %v1059_v49 }
 0x485   :  { %v2949_v25 = vpop.eup %2948 }
 0x486   :  { %v2951_v43 = vpop.eup %2950  ;;  %v1063_v46 = vmul.f32 %v2949_v25, %v2947_v1 }
 0x487   :  { %v1062_v41 = vmul.f32 %v2951_v43, %v3561_v3  ;;  %v2953_v27 = vpop.eup %2952  ;;  %v1072_v3 = vld [vmem:[#allocation6 + $0x80] sm:$0xff] }
 0x489   :  { %v3651_v42 = vadd.f32 %v1063_v46, %v1062_v41 }
 0x48b   :  { %2954 = vtanh.f32 %v3651_v42 }
 0x495   :  { %v2955_v32 = vpop.eup %2954 }
 0x496   :  { %v3654_v33 = vmul.f32 %v2955_v32, %v2953_v27 }
 0x498   :  { %1205 = vmatmul.mubr.f32.vlgmr.msra.gmra.mrb[6].mxu0 %v3654_v33  ;;  %1276 = vmatmul.mubr.f32.vlgmr.msra.gmra.mrb[10].mxu1 %v3654_v33 }
 0x499   :  { %2658 = vmatpush1.bf16.msra.mxu0 %v3574_v57  ;;  %2690 = vmatpush1.bf16.msra.mxu1 %v3577_v7 }
 0x49a   :  { %2660 = vmatprep.subr.bf16.mxu0 %v3582_v28  ;;  %2692 = vmatprep.subr.bf16.mxu1 %v3584_v23 }
 0x49b   :  { %1447 = vmatprep.mubr.f32.mxu0 %v3215_v0  ;;  %1518 = vmatprep.mubr.f32.mxu1 %v3215_v0 }
 0x49d   :  { %2662 = vmatpush1.bf16.msra.mxu0 %v3586_v30  ;;  %2694 = vmatpush1.bf16.msra.mxu1 %v3589_v40 }
 0x49e   :  { %2664 = vmatprep.subr.bf16.mxu0 %v3594_v26  ;;  %2696 = vmatprep.subr.bf16.mxu1 %v3596_v38 }
 0x4a1   :  { %2666 = vmatpush1.bf16.msra.mxu0 %v3598_v39  ;;  %2698 = vmatpush1.bf16.msra.mxu1 %v3601_v53 }
 0x4a2   :  { %2668 = vmatprep.subr.bf16.mxu0 %v3606_v55  ;;  %2700 = vmatprep.subr.bf16.mxu1 %v3608_v60 }
 0x4a5   :  { %2670 = vmatpush1.bf16.msra.mxu0 %v3533_v14  ;;  %2702 = vmatpush1.bf16.msra.mxu1 %v3610_v51 }
 0x4a6   :  { %2672 = vmatprep.subr.bf16.mxu0 %v3536_v21  ;;  %2704 = vmatprep.subr.bf16.mxu1 %v3617_v2 }
 0x4a9   :  { %2674 = vmatpush1.bf16.msra.mxu0 %v3538_v63  ;;  %2706 = vmatpush1.bf16.msra.mxu1 %v3619_v12 }
 0x4aa   :  { %2676 = vmatprep.subr.bf16.mxu0 %v3542_v17  ;;  %2708 = vmatprep.subr.bf16.mxu1 %v3623_v9 }
 0x4ad   :  { %2678 = vmatpush1.bf16.msra.mxu0 %v3544_v35  ;;  %2710 = vmatpush1.bf16.msra.mxu1 %v3627_v10 }
 0x4ae   :  { %2680 = vmatprep.subr.bf16.mxu0 %v3546_v36  ;;  %2712 = vmatprep.subr.bf16.mxu1 %v3630_v18 }
 0x4b1   :  { %2682 = vmatpush1.bf16.msra.mxu0 %v3550_v24  ;;  %2714 = vmatpush1.bf16.msra.mxu1 %v3635_v31 }
 0x4b2   :  { %2684 = vmatprep.subr.bf16.mxu0 %v3553_v29  ;;  %2716 = vmatprep.subr.bf16.mxu1 %v3638_v37 }
 0x4b5   :  { %2686 = vmatpush1.bf16.msra.mxu0 %v3556_v34  ;;  %2718 = vmatpush1.bf16.msra.mxu1 %v3643_v47 }
 0x4b6   :  { %2720 = vmatprep.subr.bf16.mxu0 %v3570_v19  ;;  %2752 = vmatprep.subr.bf16.mxu1 %v3572_v20 }
 0x56b   :  { %v1206_v52 = vpop.f32.mrb[6].mxu0  ;;  %v1277_v45 = vpop.f32.mrb[10].mxu1 }
 0x56c   :  { %v1282_v54 = vadd.f32 %v1206_v52, %v1072_v3  ;;  %v1208_v50 = vpop.f32.mrb[7].mxu0  ;;  %v1279_v56 = vpop.f32.mrb[11].mxu1  ;;  %v1284_v13 = vadd.f32 %v1277_v45, %v1074_v6 }
 0x56d   :  { %v1283_v59 = vadd.f32 %v1208_v50, %v1073_v44  ;;  %v1285_v5 = vadd.f32 %v1279_v56, %v1075_v62  ;;  %v1318_v50 = vld [vmem:[#allocation6 + $0xb8] sm:$0xff]  ;;  %v1317_v56 = vld [vmem:[#allocation6 + $0xb0] sm:$0xff] }
 0x56e   :  { %v2254_v4 = vmul.f32 -1.442695, %v1282_v54 }
 0x56f   :  { %v2255_v61 = vmul.f32 -1.442695, %v1283_v59  ;;  %v2256_v16 = vmul.f32 -1.442695, %v1285_v5 }
 0x570   :  { %2956 = vpow2.f32 %v2254_v4 }
 0x571   :  { %2958 = vpow2.f32 %v2255_v61 }
 0x572   :  { %2960 = vpow2.f32 %v2256_v16 }
 0x573   :  { %2962 = vtanh.f32 %v1284_v13 }
 0x57a   :  { %v2957_v8 = vpop.eup %2956 }
 0x57b   :  { %v2959_v15 = vpop.eup %2958  ;;  %v1289_v58 = vadd.f32 1.0, %v2957_v8 }
 0x57c   :  { %v1295_v1 = vadd.f32 1.0, %v2959_v15  ;;  %v2961_v25 = vpop.eup %2960 }
 0x57d   :  { %2964 = vrcp.f32 %v1289_v58  ;;  %v2963_v43 = vpop.eup %2962  ;;  %v1302_v27 = vadd.f32 1.0, %v2961_v25 }
 0x57e   :  { %2966 = vrcp.f32 %v1295_v1 }
 0x57f   :  { %2968 = vrcp.f32 %v1302_v27  ;;  %v1861_v27 = vld [vmem:[#allocation12 + $0x1c0] sm:$0xff] }
 0x587   :  { %v2965_v46 = vpop.eup %2964 }
 0x588   :  { %v2967_v49 = vpop.eup %2966  ;;  %v1306_v41 = vmul.f32 %v2965_v46, %v2963_v43 }
 0x589   :  { %v1305_v32 = vmul.f32 %v2967_v49, %v3651_v42  ;;  %v2969_v44 = vpop.eup %2968 }
 0x58b   :  { %v3693_v3 = vadd.f32 %v1306_v41, %v1305_v32  ;;  %v1865_v32 = vld [vmem:[#allocation12 + $0x1e0] sm:$0xff] }
 0x58d   :  { %2970 = vtanh.f32 %v3693_v3 }
 0x597   :  { %v2971_v52 = vpop.eup %2970 }
 0x598   :  { %v3696_v45 = vmul.f32 %v2971_v52, %v2969_v44  ;;  %v2061_v44 = vld [vmem:[#allocation14 + $0x8] sm:$0xff]  ;;  %v2813_v52 = vpack.c.bf16 %v1865_v32, %v1861_v27 }
 0x59a   :  { %1448 = vmatmul.mubr.f32.vlgmr.msra.gmra.mrb[8].mxu0 %v3696_v45  ;;  %1519 = vmatmul.mubr.f32.vlgmr.msra.gmra.mrb[12].mxu1 %v3696_v45 }
 0x59b   :  { %2722 = vmatpush1.bf16.msra.mxu0 %v3574_v57  ;;  %2754 = vmatpush1.bf16.msra.mxu1 %v3577_v7 }
 0x59c   :  { %2724 = vmatprep.subr.bf16.mxu0 %v3582_v28  ;;  %2756 = vmatprep.subr.bf16.mxu1 %v3584_v23 }
 0x59d   :  { %1690 = vmatprep.mubr.f32.mxu0 %v3215_v0  ;;  %1761 = vmatprep.mubr.f32.mxu1 %v3215_v0 }
 0x59f   :  { %2726 = vmatpush1.bf16.msra.mxu0 %v3586_v30  ;;  %2758 = vmatpush1.bf16.msra.mxu1 %v3589_v40 }
 0x5a0   :  { %2728 = vmatprep.subr.bf16.mxu0 %v3594_v26  ;;  %2760 = vmatprep.subr.bf16.mxu1 %v3596_v38 }
 0x5a3   :  { %2730 = vmatpush1.bf16.msra.mxu0 %v3598_v39  ;;  %2762 = vmatpush1.bf16.msra.mxu1 %v3601_v53 }
 0x5a4   :  { %2732 = vmatprep.subr.bf16.mxu0 %v3606_v55  ;;  %2764 = vmatprep.subr.bf16.mxu1 %v3608_v60 }
 0x5a7   :  { %2734 = vmatpush1.bf16.msra.mxu0 %v3533_v14  ;;  %2766 = vmatpush1.bf16.msra.mxu1 %v3610_v51  ;;  %v1315_v14 = vld [vmem:[#allocation6 + $0xa0] sm:$0xff] }
 0x5a8   :  { %2736 = vmatprep.subr.bf16.mxu0 %v3536_v21  ;;  %2768 = vmatprep.subr.bf16.mxu1 %v3617_v2  ;;  %v1316_v21 = vld [vmem:[#allocation6 + $0xa8] sm:$0xff] }
 0x5ab   :  { %2738 = vmatpush1.bf16.msra.mxu0 %v3538_v63  ;;  %2770 = vmatpush1.bf16.msra.mxu1 %v3619_v12 }
 0x5ac   :  { %2740 = vmatprep.subr.bf16.mxu0 %v3542_v17  ;;  %2772 = vmatprep.subr.bf16.mxu1 %v3623_v9 }
 0x5af   :  { %2742 = vmatpush1.bf16.msra.mxu0 %v3544_v35  ;;  %2774 = vmatpush1.bf16.msra.mxu1 %v3627_v10 }
 0x5b0   :  { %2744 = vmatprep.subr.bf16.mxu0 %v3546_v36  ;;  %2776 = vmatprep.subr.bf16.mxu1 %v3630_v18 }
 0x5b3   :  { %2746 = vmatpush1.bf16.msra.mxu0 %v3550_v24  ;;  %2778 = vmatpush1.bf16.msra.mxu1 %v3635_v31 }
 0x5b4   :  { %2748 = vmatprep.subr.bf16.mxu0 %v3553_v29  ;;  %2780 = vmatprep.subr.bf16.mxu1 %v3638_v37 }
 0x5b7   :  { %2750 = vmatpush1.bf16.msra.mxu0 %v3556_v34  ;;  %2782 = vmatpush1.bf16.msra.mxu1 %v3643_v47 }
 0x5b8   :  { %2784 = vmatprep.subr.bf16.mxu0 %v3570_v19  ;;  %2816 = vmatprep.subr.bf16.mxu1 %v3572_v20 }
 0x66d   :  { %v1449_v63 = vpop.f32.mrb[8].mxu0  ;;  %v1520_v17 = vpop.f32.mrb[12].mxu1 }
 0x66e   :  { %v1525_v35 = vadd.f32 %v1449_v63, %v1315_v14  ;;  %v1451_v36 = vpop.f32.mrb[9].mxu0  ;;  %v1522_v24 = vpop.f32.mrb[13].mxu1  ;;  %v1527_v4 = vadd.f32 %v1520_v17, %v1317_v56  ;;  %v1559_v63 = vld [vmem:[#allocation6 + $0xc8] sm:$0xff] }
 0x66f   :  { %v1526_v42 = vadd.f32 %v1451_v36, %v1316_v21  ;;  %v1528_v34 = vadd.f32 %v1522_v24, %v1318_v50  ;;  %v1558_v21 = vld [vmem:[#allocation6 + $0xc0] sm:$0xff] }
 0x670   :  { %v2257_v54 = vmul.f32 -1.442695, %v1525_v35 }
 0x671   :  { %v2258_v29 = vmul.f32 -1.442695, %v1526_v42  ;;  %v2259_v59 = vmul.f32 -1.442695, %v1528_v34  ;;  %v1561_v34 = vld [vmem:[#allocation6 + $0xd8] sm:$0xff] }
 0x672   :  { %2972 = vpow2.f32 %v2257_v54 }
 0x673   :  { %2974 = vpow2.f32 %v2258_v29 }
 0x674   :  { %2976 = vpow2.f32 %v2259_v59  ;;  %v1560_v59 = vld [vmem:[#allocation6 + $0xd0] sm:$0xff] }
 0x675   :  { %2978 = vtanh.f32 %v1527_v4 }
 0x67c   :  { %v2973_v19 = vpop.eup %2972 }
 0x67d   :  { %v2975_v61 = vpop.eup %2974  ;;  %v1532_v20 = vadd.f32 1.0, %v2973_v19 }
 0x67e   :  { %v1538_v62 = vadd.f32 1.0, %v2975_v61  ;;  %v2977_v5 = vpop.eup %2976 }
 0x67f   :  { %2980 = vrcp.f32 %v1532_v20  ;;  %v2979_v6 = vpop.eup %2978  ;;  %v1545_v15 = vadd.f32 1.0, %v2977_v5 }
 0x680   :  { %2982 = vrcp.f32 %v1538_v62 }
 0x681   :  { %2984 = vrcp.f32 %v1545_v15 }
 0x689   :  { %v2981_v16 = vpop.eup %2980 }
 0x68a   :  { %v2983_v13 = vpop.eup %2982  ;;  %v1549_v8 = vmul.f32 %v2981_v16, %v2979_v6 }
 0x68b   :  { %v1548_v58 = vmul.f32 %v2983_v13, %v3693_v3  ;;  %v2985_v25 = vpop.eup %2984  ;;  %v2060_v3 = vld [vmem:[#allocation14] sm:$0xff] }
 0x68c   :  { %v2847_v14 = vpack.c.bf16 %v2061_v44, %v2060_v3 }
 0x68d   :  { %v3735_v1 = vadd.f32 %v1549_v8, %v1548_v58 }
 0x68f   :  { %2986 = vtanh.f32 %v3735_v1 }
 0x699   :  { %v2987_v43 = vpop.eup %2986 }
 0x69a   :  { %v3738_v46 = vmul.f32 %v2987_v43, %v2985_v25 }
 0x69c   :  { %1691 = vmatmul.mubr.f32.vlgmr.msra.gmra.mrb[10].mxu0 %v3738_v46  ;;  %1762 = vmatmul.mubr.f32.vlgmr.msra.gmra.mrb[14].mxu1 %v3738_v46 }
 0x69d   :  { %2786 = vmatpush1.bf16.msra.mxu0 %v3574_v57  ;;  %2818 = vmatpush1.bf16.msra.mxu1 %v3577_v7  ;;  %v1833_v57 = vld [vmem:[#allocation12 + $0xe0] sm:$0xff] }
 0x69e   :  { %2788 = vmatprep.subr.bf16.mxu0 %v3582_v28  ;;  %2820 = vmatprep.subr.bf16.mxu1 %v3584_v23  ;;  %v1838_v28 = vld [vmem:[#allocation12 + $0x108] sm:$0xff] }
 0x69f   :  { %1933 = vmatprep.mubr.f32.mxu0 %v3215_v0  ;;  %2004 = vmatprep.mubr.f32.mxu1 %v3215_v0  ;;  %v1829_v0 = vld [vmem:[#allocation12 + $0xc0] sm:$0xff]  ;;  %v1842_v23 = vld [vmem:[#allocation12 + $0x128] sm:$0xff] }
 0x6a0   :  { %v2797_v7 = vpack.c.bf16 %v1833_v57, %v1829_v0  ;;  %v2062_v0 = vld [vmem:[#allocation14 + $0x10] sm:$0xff]  ;;  %v2063_v57 = vld [vmem:[#allocation14 + $0x18] sm:$0xff] }
 0x6a1   :  { %2790 = vmatpush1.bf16.msra.mxu0 %v3586_v30  ;;  %2822 = vmatpush1.bf16.msra.mxu1 %v3589_v40  ;;  %v2799_v30 = vpack.c.bf16 %v1842_v23, %v1838_v28  ;;  %v1837_v40 = vld [vmem:[#allocation12 + $0x100] sm:$0xff] }
 0x6a2   :  { %2792 = vmatprep.subr.bf16.mxu0 %v3594_v26  ;;  %2824 = vmatprep.subr.bf16.mxu1 %v3596_v38  ;;  %v1841_v26 = vld [vmem:[#allocation12 + $0x120] sm:$0xff] }
 0x6a3   :  { %v2801_v38 = vpack.c.bf16 %v1841_v26, %v1837_v40  ;;  %v2064_v40 = vld [vmem:[#allocation14 + $0x20] sm:$0xff]  ;;  %v2065_v26 = vld [vmem:[#allocation14 + $0x28] sm:$0xff] }
 0x6a5   :  { %2794 = vmatpush1.bf16.msra.mxu0 %v3598_v39  ;;  %2826 = vmatpush1.bf16.msra.mxu1 %v3601_v53  ;;  %v1846_v39 = vld [vmem:[#allocation12 + $0x148] sm:$0xff] }
 0x6a6   :  { %2796 = vmatprep.subr.bf16.mxu0 %v3606_v55  ;;  %2828 = vmatprep.subr.bf16.mxu1 %v3608_v60  ;;  %v1850_v53 = vld [vmem:[#allocation12 + $0x168] sm:$0xff]  ;;  %v1845_v55 = vld [vmem:[#allocation12 + $0x140] sm:$0xff] }
 0x6a7   :  { %v2803_v60 = vpack.c.bf16 %v1850_v53, %v1846_v39  ;;  %v2067_v39 = vld [vmem:[#allocation14 + $0x38] sm:$0xff] }
 0x6a9   :  { %2830 = vmatpush1.bf16.msra.mxu1 %v3610_v51  ;;  %2798 = vmatpush1.bf16.msra.mxu0 %v2797_v7  ;;  %v1849_v51 = vld [vmem:[#allocation12 + $0x160] sm:$0xff] }
 0x6aa   :  { %2832 = vmatprep.subr.bf16.mxu1 %v3617_v2  ;;  %2800 = vmatprep.subr.bf16.mxu0 %v2799_v30  ;;  %v1854_v2 = vld [vmem:[#allocation12 + $0x188] sm:$0xff]  ;;  %v2851_v30 = vpack.c.bf16 %v2063_v57, %v2062_v0 }
 0x6ad   :  { %2834 = vmatpush1.bf16.msra.mxu1 %v3619_v12  ;;  %2802 = vmatpush1.bf16.msra.mxu0 %v2801_v38  ;;  %v1858_v12 = vld [vmem:[#allocation12 + $0x1a8] sm:$0xff]  ;;  %v2066_v38 = vld [vmem:[#allocation14 + $0x30] sm:$0xff] }
 0x6ae   :  { %2836 = vmatprep.subr.bf16.mxu1 %v3623_v9  ;;  %v2805_v9 = vpack.c.bf16 %v1849_v51, %v1845_v55  ;;  %2804 = vmatprep.subr.bf16.mxu0 %v2803_v60  ;;  %v2859_v53 = vpack.c.bf16 %v2067_v39, %v2066_v38  ;;  %v2068_v55 = vld [vmem:[#allocation14 + $0x40] sm:$0xff]  ;;  %v2069_v60 = vld [vmem:[#allocation14 + $0x48] sm:$0xff] }
 0x6af   :  { %v2863_v51 = vpack.c.bf16 %v2069_v60, %v2068_v55 }
 0x6b1   :  { %2838 = vmatpush1.bf16.msra.mxu1 %v3627_v10  ;;  %v2807_v10 = vpack.c.bf16 %v1858_v12, %v1854_v2  ;;  %2806 = vmatpush1.bf16.msra.mxu0 %v2805_v9  ;;  %v2070_v2 = vld [vmem:[#allocation14 + $0x50] sm:$0xff]  ;;  %v2071_v12 = vld [vmem:[#allocation14 + $0x58] sm:$0xff] }
 0x6b2   :  { %2840 = vmatprep.subr.bf16.mxu1 %v3630_v18  ;;  %v1853_v18 = vld [vmem:[#allocation12 + $0x180] sm:$0xff]  ;;  %v2867_v9 = vpack.c.bf16 %v2071_v12, %v2070_v2 }
 0x6b3   :  { %2808 = vmatprep.subr.bf16.mxu0 %v2807_v10  ;;  %v2072_v10 = vld [vmem:[#allocation14 + $0x60] sm:$0xff] }
 0x6b5   :  { %2842 = vmatpush1.bf16.msra.mxu1 %v3635_v31  ;;  %v1857_v31 = vld [vmem:[#allocation12 + $0x1a0] sm:$0xff] }
 0x6b6   :  { %2844 = vmatprep.subr.bf16.mxu1 %v3638_v37  ;;  %v1862_v37 = vld [vmem:[#allocation12 + $0x1c8] sm:$0xff]  ;;  %v2809_v49 = vpack.c.bf16 %v1857_v31, %v1853_v18  ;;  %v2074_v31 = vld [vmem:[#allocation14 + $0x70] sm:$0xff] }
 0x6b7   :  { %v2073_v18 = vld [vmem:[#allocation14 + $0x68] sm:$0xff] }
 0x6b8   :  { %2810 = vmatpush1.bf16.msra.mxu0 %v2809_v49  ;;  %v1801_v49 = vld [vmem:[#allocation6 + $0xe0] sm:$0xff] }
 0x6b9   :  { %2846 = vmatpush1.bf16.msra.mxu1 %v3643_v47  ;;  %v1866_v47 = vld [vmem:[#allocation12 + $0x1e8] sm:$0xff] }
 0x6ba   :  { %v2811_v41 = vpack.c.bf16 %v1866_v47, %v1862_v37  ;;  %v2075_v37 = vld [vmem:[#allocation14 + $0x78] sm:$0xff] }
 0x6bb   :  { %v2875_v47 = vpack.c.bf16 %v2075_v37, %v2074_v31 }
 0x6bc   :  { %2812 = vmatprep.subr.bf16.mxu0 %v2811_v41  ;;  %v1802_v41 = vld [vmem:[#allocation6 + $0xe8] sm:$0xff] }
 0x6bd   :  { %2814 = vmatpush1.bf16.msra.mxu0 %v2813_v52 }
 0x6be   :  { %2848 = vmatprep.subr.bf16.mxu0 %v2847_v14 }
 0x76f   :  { %v1692_v17 = vpop.f32.mrb[10].mxu0  ;;  %v1763_v35 = vpop.f32.mrb[14].mxu1 }
 0x770   :  { %v1768_v36 = vadd.f32 %v1692_v17, %v1558_v21  ;;  %v1694_v24 = vpop.f32.mrb[11].mxu0  ;;  %v1765_v42 = vpop.f32.mrb[15].mxu1  ;;  %v1770_v19 = vadd.f32 %v1763_v35, %v1560_v59 }
 0x771   :  { %v1769_v54 = vadd.f32 %v1694_v24, %v1559_v63  ;;  %v1771_v56 = vadd.f32 %v1765_v42, %v1561_v34 }
 0x772   :  { %v2260_v29 = vmul.f32 -1.442695, %v1768_v36 }
 0x773   :  { %v2261_v50 = vmul.f32 -1.442695, %v1769_v54  ;;  %v2262_v4 = vmul.f32 -1.442695, %v1771_v56 }
 0x774   :  { %2988 = vpow2.f32 %v2260_v29 }
 0x775   :  { %2990 = vpow2.f32 %v2261_v50 }
 0x776   :  { %2992 = vpow2.f32 %v2262_v4  ;;  %v3779_v4 = vld [vmem:[%s3833_s5] ss:$0 sm:$0xff]  ;;  %s3216_s5 = smov [#allocation16]  }
 0x777   :  { %2994 = vtanh.f32 %v1770_v19  ;;  %s2214_s21 = sshll.u32 %s3216_s5, 4  ;;  %s2215_s21 = int_to_ptr.vmem [resolvable:$true] %s2214_s21 }
 0x778   :  { %s3130_s22 = scalar_lea.vmem %s2215_s21, 128  ;;  %p3135_p13 = scmp.lt.s32.totalorder %s2215_s21, %s2215_s21 }
 0x779   :  { %p3131_p12 = scmp.ne.s32.totalorder %s2215_s21, %s3130_s22  ;;  %p3136_p0 = scmp.lt.s32.totalorder %s3130_s22, %s3130_s22 }
 0x77b   :  { %p3137_p1 = por %p3136_p0, %p3135_p13 }
 0x77d   :  { %p3138_p2 = pnand %p3137_p1, %p3131_p12 }
 0x77e   :  { %v2989_v61 = vpop.eup %2988 }
 0x77f   :  { %v2991_v20 = vpop.eup %2990  ;;  %v1775_v62 = vadd.f32 1.0, %v2989_v61 }
 0x780   :  { %v1781_v5 = vadd.f32 1.0, %v2991_v20  ;;  %v2993_v6 = vpop.eup %2992 }
 0x781   :  { %2996 = vrcp.f32 %v1775_v62  ;;  %v2995_v16 = vpop.eup %2994  ;;  %v1788_v58 = vadd.f32 1.0, %v2993_v6 }
 0x782   :  { %2998 = vrcp.f32 %v1781_v5 }
 0x783   :  { %3000 = vrcp.f32 %v1788_v58 }
 0x78b   :  { %v2997_v13 = vpop.eup %2996 }
 0x78c   :  { %v2999_v8 = vpop.eup %2998  ;;  %v1792_v15 = vmul.f32 %v2997_v13, %v2995_v16 }
 0x78d   :  { %v1791_v25 = vmul.f32 %v2999_v8, %v3735_v1  ;;  %v3001_v7 = vpop.eup %3000  ;;  %v2855_v1 = vpack.c.bf16 %v2065_v26, %v2064_v40 }
 0x78f   :  { %v3766_v43 = vadd.f32 %v1792_v15, %v1791_v25 }
 0x791   :  { %3002 = vtanh.f32 %v3766_v43 }
 0x79b   :  { %v3003_v28 = vpop.eup %3002 }
 0x79c   :  { %v1795_v23 = vmul.f32 %v3003_v28, %v3001_v7 }
 0x79e   :  { %1934 = vmatmul.mubr.f32.vlgmr.msra.gmra.mrb[12].mxu0 %v1795_v23  ;;  %2005 = vmatmul.mubr.f32.vlgmr.msra.gmra.mrb[16].mxu1 %v1795_v23 }
 0x79f   :  { %2850 = vmatpush3.bf16.msra.mxu0 %v2847_v14  ;;  %2323 = vmatprep.mubr.f32.mxu0 %v3464_v48  ;;  %v2871_v48 = vpack.c.bf16 %v2073_v18, %v2072_v10 }
 0x7a0   :  { %2852 = vmatprep.subr.bf16.mxu0 %v2851_v30 }
 0x7a3   :  { %2854 = vmatpush3.bf16.msra.mxu0 %v2851_v30 }
 0x7a4   :  { %2856 = vmatprep.subr.bf16.mxu0 %v2855_v1 }
 0x7a7   :  { %2858 = vmatpush3.bf16.msra.mxu0 %v2855_v1 }
 0x7a8   :  { %2860 = vmatprep.subr.bf16.mxu0 %v2859_v53 }
 0x7ab   :  { %2862 = vmatpush3.bf16.msra.mxu0 %v2859_v53 }
 0x7ac   :  { %2864 = vmatprep.subr.bf16.mxu0 %v2863_v51 }
 0x7af   :  { %2866 = vmatpush3.bf16.msra.mxu0 %v2863_v51 }
 0x7b0   :  { %2868 = vmatprep.subr.bf16.mxu0 %v2867_v9 }
 0x7b3   :  { %2870 = vmatpush3.bf16.msra.mxu0 %v2867_v9 }
 0x7b4   :  { %2872 = vmatprep.subr.bf16.mxu0 %v2871_v48 }
 0x7b7   :  { %2874 = vmatpush3.bf16.msra.mxu0 %v2871_v48 }
 0x7b8   :  { %2876 = vmatprep.subr.bf16.mxu0 %v2875_v47 }
 0x7bb   :  { %2878 = vmatpush3.bf16.msra.mxu0 %v2875_v47 }
 0x7be   :  { %2324 = vmatmul.mubr.f32.vlgmr.msra.gmra.mrb[14].mxu0 %v3506_v22  ;;  %v1804_v22 = vld [vmem:[#allocation6 + $0xf8] sm:$0xff] }
 0x7bf   :  { %2326 = vmatprep.mubr.f32.mxu0 %v3564_v11 }
 0x7c2   :  { %2327 = vmatmul.mubr.f32.gmra.mrb[16].mxu0 %v3654_v33  ;;  %v1803_v33 = vld [vmem:[#allocation6 + $0xf0] sm:$0xff] }
 0x7c3   :  { %2329 = vmatprep.mubr.f32.mxu0 %v3696_v45 }
 0x7c6   :  { %2330 = vmatmul.mubr.f32.gmra.mrb[18].mxu0 %v3738_v46 }
 0x7c7   :  { %2332 = vmatprep.mubr.f32.mxu0 %v1795_v23 }
 0x871   :  { %v1935_v27 = vpop.f32.mrb[12].mxu0  ;;  %v2006_v32 = vpop.f32.mrb[16].mxu1 }
 0x872   :  { %v2011_v3 = vadd.f32 %v1935_v27, %v1801_v49  ;;  %v1937_v44 = vpop.f32.mrb[13].mxu0  ;;  %v2008_v52 = vpop.f32.mrb[17].mxu1  ;;  %v2013_v45 = vadd.f32 %v2006_v32, %v1803_v33 }
 0x873   :  { %v2012_v14 = vadd.f32 %v1937_v44, %v1802_v41  ;;  %v2014_v11 = vadd.f32 %v2008_v52, %v1804_v22 }
 0x874   :  { %v2263_v21 = vmul.f32 -1.442695, %v2011_v3 }
 0x875   :  { %v2264_v63 = vmul.f32 -1.442695, %v2012_v14  ;;  %v2265_v17 = vmul.f32 -1.442695, %v2014_v11 }
 0x876   :  { %3004 = vpow2.f32 %v2263_v21 }
 0x877   :  { %3006 = vpow2.f32 %v2264_v63 }
 0x878   :  { %3008 = vpow2.f32 %v2265_v17 }
 0x879   :  { %3010 = vtanh.f32 %v2013_v45 }
 0x880   :  { %v3005_v35 = vpop.eup %3004 }
 0x881   :  { %v3007_v46 = vpop.eup %3006  ;;  %v2018_v36 = vadd.f32 1.0, %v3005_v35 }
 0x882   :  { %v2024_v24 = vadd.f32 1.0, %v3007_v46  ;;  %v3009_v42 = vpop.eup %3008 }
 0x883   :  { %3012 = vrcp.f32 %v2018_v36  ;;  %v3011_v54 = vpop.eup %3010  ;;  %v2031_v56 = vadd.f32 1.0, %v3009_v42 }
 0x884   :  { %3014 = vrcp.f32 %v2024_v24 }
 0x885   :  { %3016 = vrcp.f32 %v2031_v56 }
 0x88d   :  { %v3013_v29 = vpop.eup %3012 }
 0x88e   :  { %v3015_v50 = vpop.eup %3014  ;;  %v2035_v34 = vmul.f32 %v3013_v29, %v3011_v54 }
 0x88f   :  { %v2034_v59 = vmul.f32 %v3015_v50, %v3766_v43  ;;  %v3017_v0 = vpop.eup %3016 }
 0x891   :  { %v2325_v19 = vpop.f32.mrb[14].mxu0  ;;  %v2036_v61 = vadd.f32 %v2035_v34, %v2034_v59 }
 0x892   :  { %v2155_v20 = vadd.f32 %v2325_v19, %v3779_v4  ;;  %v2149_v62 = vpop.f32.mrb[15].mxu0 }
 0x893   :  { %v2150_v5 = vadd.f32 %v3779_v4, %v2149_v62  ;;  %3018 = vtanh.f32 %v2036_v61  ;;  %2051 = vst [vmem:[#allocation18] sm:$0xff] %v2036_v61 }
 0x894   :  { %2189 = vst [vmem:[#allocation15 + $0x8] sm:$0xff] %v2155_v20 }
 0x895   :  { %2188 = vst [vmem:[#allocation15] sm:$0xff] %v2150_v5  ;;  %v2328_v6 = vpop.f32.mrb[16].mxu0 }
 0x896   :  { %v2165_v16 = vadd.f32 %v2328_v6, %v3779_v4  ;;  %v2159_v13 = vpop.f32.mrb[17].mxu0 }
 0x897   :  { %v2160_v8 = vadd.f32 %v3779_v4, %v2159_v13 }
 0x898   :  { %2191 = vst [vmem:[#allocation15 + $0x18] sm:$0xff] %v2165_v16 }
 0x899   :  { %2190 = vst [vmem:[#allocation15 + $0x10] sm:$0xff] %v2160_v8  ;;  %v2331_v15 = vpop.f32.mrb[18].mxu0 }
 0x89a   :  { %v2175_v58 = vadd.f32 %v2331_v15, %v3779_v4  ;;  %v2169_v25 = vpop.f32.mrb[19].mxu0 }
 0x89b   :  { %v2170_v43 = vadd.f32 %v3779_v4, %v2169_v25 }
 0x89c   :  { %2193 = vst [vmem:[#allocation15 + $0x28] sm:$0xff] %v2175_v58 }
 0x89d   :  { %v3019_v57 = vpop.eup %3018  ;;  %2192 = vst [vmem:[#allocation15 + $0x20] sm:$0xff] %v2170_v43 }
 0x89e   :  { %v2038_v7 = vmul.f32 %v3019_v57, %v3017_v0 }
 0x8a0   :  { %2333 = vmatmul.mubr.f32.gmra.mrb[20].mxu0 %v2038_v7  ;;  %2049 = vst [vmem:[#allocation16] sm:$0xff] %v2038_v7 }
 0x8a1   :  { %3141 = shalt.err (!%p3138_p2)
}
 0x8a2   :  { %s3142_s25 = scalar_lea.hbm %s3835_s7, 128 }
 0x8a3   :  { %p3143_p3 = scmp.ne.s32.totalorder %s3835_s7, %s3142_s25  ;;  %p3146_p4 = scmp.lt.u32.totalorder %s3142_s25, %s3835_s7 }
 0x8a5   :  { %p3148_p5 = pnand %p3146_p4, %p3143_p3 }
 0x8a7   :  { %3151 = shalt.err (!%p3148_p5)
}
 0x8a8   :  { %2217 = dma.vmem_to_hbm [thread:$0]  %s2215_s21, 128, %s3835_s7, [#allocation17]  }
 0x8a9   :  { %s3217_s20 = smov [#allocation18]  }
 0x8aa   :  { %s2224_s28 = sshll.u32 %s3217_s20, 4  ;;  %s2225_s28 = int_to_ptr.vmem [resolvable:$true] %s2224_s28 }
 0x8ab   :  { %s3152_s29 = scalar_lea.vmem %s2225_s28, 128  ;;  %p3157_p7 = scmp.lt.s32.totalorder %s2225_s28, %s2225_s28 }
 0x8ac   :  { %p3153_p6 = scmp.ne.s32.totalorder %s2225_s28, %s3152_s29  ;;  %p3158_p8 = scmp.lt.s32.totalorder %s3152_s29, %s3152_s29 }
 0x8ae   :  { %p3159_p9 = por %p3158_p8, %p3157_p7 }
 0x8b0   :  { %p3160_p10 = pnand %p3159_p9, %p3153_p6 }
 0x8b2   :  { %3163 = shalt.err (!%p3160_p10)
}
 0x8b3   :  { %s3164_s12 = scalar_lea.hbm %s3836_s8, 128 }
 0x8b4   :  { %p3165_p11 = scmp.ne.s32.totalorder %s3836_s8, %s3164_s12  ;;  %p3168_p12 = scmp.lt.u32.totalorder %s3164_s12, %s3836_s8 }
 0x8b6   :  { %p3170_p13 = pnand %p3168_p12, %p3165_p11 }
 0x8b8   :  { %3173 = shalt.err (!%p3170_p13)
}
 0x8b9   :  { %2227 = dma.vmem_to_hbm [thread:$0]  %s2225_s28, 128, %s3836_s8, [#allocation17]  }
 0x8ba   :  { %s3218_s18 = smov [#allocation15]  }
 0x8bb   :  { %s2201_s4 = sshll.u32 %s3218_s18, 4  ;;  %s2202_s4 = int_to_ptr.vmem [resolvable:$true] %s2201_s4 }
 0x8bc   :  { %s3174_s19 = scalar_lea.vmem %s2202_s4, 1024  ;;  %p3179_p1 = scmp.lt.s32.totalorder %s2202_s4, %s2202_s4 }
 0x8bd   :  { %p3175_p0 = scmp.ne.s32.totalorder %s2202_s4, %s3174_s19  ;;  %p3180_p2 = scmp.lt.s32.totalorder %s3174_s19, %s3174_s19 }
 0x8bf   :  { %p3181_p3 = por %p3180_p2, %p3179_p1 }
 0x8c1   :  { %p3182_p4 = pnand %p3181_p3, %p3175_p0 }
 0x973   :  { %v2334_v28 = vpop.f32.mrb[20].mxu0 }
 0x974   :  { %v2185_v23 = vadd.f32 %v2334_v28, %v3779_v4  ;;  %v2179_v30 = vpop.f32.mrb[21].mxu0 }
 0x975   :  { %v2180_v40 = vadd.f32 %v3779_v4, %v2179_v30 }
 0x976   :  { %2195 = vst [vmem:[#allocation15 + $0x38] sm:$0xff] %v2185_v23 }
 0x977   :  { %2194 = vst [vmem:[#allocation15 + $0x30] sm:$0xff] %v2180_v40 }
 0x978   :  { %3185 = shalt.err (!%p3182_p4)
}
 0x979   :  { %s3186_s21 = scalar_lea.hbm %s3834_s6, 1024 }
 0x97a   :  { %p3187_p5 = scmp.ne.s32.totalorder %s3834_s6, %s3186_s21  ;;  %p3190_p6 = scmp.lt.u32.totalorder %s3186_s21, %s3834_s6 }
 0x97c   :  { %p3192_p7 = pnand %p3190_p6, %p3187_p5 }
 0x97e   :  { %3195 = shalt.err (!%p3192_p7)
}
 0x97f   :  { %2207 = dma.vmem_to_hbm [thread:$0]  %s2202_s4, 1024, %s3834_s6, [#allocation8], %s3213_s2, %s3213_s2, %s3214_s17  }
 0x980   :  { %3202 = dma.done.wait [#allocation8], 1024  }
 0x981   :  { %3203 = vsyncadd [#allocation8], 4294966272 }
 0x982   :  { %3204 = dma.done.wait [#allocation17], 256  }
 0x983   :  { %3205 = vsyncadd [#allocation17], 4294967040 }
 0x984   :  { %2237 = vsyncpa [#allocation7], 1 }
 0x985   :  { %2238 = vsyncpa [#allocation10], 1 }
 0x986   :  { %2239 = vsyncpa [#allocation13], 1 }
 0x987   :  { %2240 = vsyncpa [#allocation8], 1 }
 0x988   :  { %2241 = vsyncpa [#allocation17], 1 }

</bundles_post_ra>
